<compile_context>
chip_gen: v6e
topology: v6e:2x2x1
jax: 0.10.0
libtpu: 0.0.40
codegen_flags: <defaults>
</compile_context>

<pallas_src>
import functools

import jax
import jax.numpy as jnp
from jax.experimental import pallas as pl
from jax.experimental.pallas import tpu as pltpu


def mha_kernel(x_ref, wqkv_ref, wo_ref, bo_ref, o_ref, *,
               heads, dim_head, batched_heads, compute_dtype):
    H, dh = heads, dim_head
    inner = H * dh
    scale = float(dh) ** -0.5
    bt, n, d = x_ref.shape
    dp = o_ref.shape[-1]
    cdt = compute_dtype

    # Matmul operands in bf16 (or the caller's low-precision dtype); MXU accumulates f32.
    x = x_ref[...].astype(cdt)                                       # [Bt, N, D]

    # ---- fused QKV projection: one lane-dense matmul ----
    qkv = jnp.dot(x.reshape(bt * n, d), wqkv_ref[...],
                  preferred_element_type=jnp.float32)                # [Bt*N, 3*inner] f32
    qkv = qkv.reshape(bt, n, 3 * inner)

    # Fold the 1/sqrt(dh) scale into q (cheaper than scaling the N x N scores),
    # in f32 before the cast so no extra rounding is introduced.
    q_all = (qkv[:, :, 0 * inner:1 * inner] * scale).astype(cdt)     # [Bt, N, inner]
    k_all = qkv[:, :, 1 * inner:2 * inner].astype(cdt)
    v_all = qkv[:, :, 2 * inner:3 * inner].astype(cdt)

    if batched_heads:
        # Head-batched attention core: one dot_general stream per contraction, batch
        # dims (b, h), contracting on dh directly.  einsum's natural output order is
        # requested so no operand/output transposes are emitted.
        # (If this ever becomes XLU-bound at larger N, check with pl.lower_as_mlir
        #  whether a k relayout sneaks in and materialize K transposed once per step.)
        q = q_all.reshape(bt, n, H, dh)
        k = k_all.reshape(bt, n, H, dh)
        v = v_all.reshape(bt, n, H, dh)

        s = jnp.einsum('bnhd,bmhd->bhnm', q, k,
                       preferred_element_type=jnp.float32)           # [Bt, H, N, N] f32
        s = s - jnp.max(s, axis=-1, keepdims=True)                   # stable softmax
        e = jnp.exp(s)
        p = e * pl.reciprocal(jnp.sum(e, axis=-1, keepdims=True), approx=True)

        o = jnp.einsum('bhnm,bmhd->bhnd', p.astype(cdt), v,
                       preferred_element_type=jnp.float32)           # [Bt, H, N, dh] f32
        # Register-level head concat 'b h n d -> b n (h d)' via cheap major-dim slices
        # (no VMEM scratch, no masked stores).
        o_cat = jnp.concatenate([o[:, h] for h in range(H)], axis=-1)  # [Bt, N, inner]
    else:
        # Fallback: static per-head loop (known-good lowering), still with the
        # register-level concat instead of a VMEM scratch buffer.
        head_outs = []
        for h in range(H):
            sl = slice(h * dh, (h + 1) * dh)
            qh, kh, vh = q_all[:, :, sl], k_all[:, :, sl], v_all[:, :, sl]
            s = jnp.einsum('bnd,bmd->bnm', qh, kh,
                           preferred_element_type=jnp.float32)       # [Bt, N, N] f32
            s = s - jnp.max(s, axis=-1, keepdims=True)
            e = jnp.exp(s)
            p = e * pl.reciprocal(jnp.sum(e, axis=-1, keepdims=True), approx=True)
            head_outs.append(jnp.einsum('bnm,bmd->bnd', p.astype(cdt), vh,
                                        preferred_element_type=jnp.float32))
        o_cat = jnp.concatenate(head_outs, axis=-1)                  # [Bt, N, inner] f32

    # ---- fused output projection: one matmul + f32 bias ----
    out = jnp.dot(o_cat.reshape(bt * n, inner).astype(cdt), wo_ref[...],
                  preferred_element_type=jnp.float32)                # [Bt*N, Dp] f32
    out = out + bo_ref[...]                                          # bias broadcast (f32)
    o_ref[...] = out.reshape(bt, n, dp).astype(o_ref.dtype)


def _round_up(v, m):
    return (v + m - 1) // m * m


def _pick_batch_tile(batch, seq, *, target_rows=1024, min_steps=2,
                     budget=None, step_bytes=None):
    """Largest divisor Bt of `batch` with Bt*seq <= target_rows that fits the VMEM
    budget, while keeping at least `min_steps` grid steps on the parallel axis
    (v7x: two TensorCores shard that axis)."""
    want = max(1, target_rows // max(seq, 1))
    if batch >= min_steps:
        want = min(want, batch // min_steps)
    best = 1
    for c in range(1, batch + 1):
        if batch % c or c > want:
            continue
        if budget is not None and step_bytes is not None and step_bytes(c) > budget:
            continue
        best = c
    return best


# Config = (batched_heads, single_buffer_weights); tried in order, first that lowers wins.
_CONFIG_ORDER = ((True, True), (True, False), (False, True), (False, False))
_config_cache = {}


def multi_head_attention(x, w_qkv, w_out, b_out, *, heads, dim_head):
    """x: [B, N, D]; w_qkv: [3*H*dh, D] (nn.Linear layout); w_out: [D, H*dh]; b_out: [D]."""
    B, N, D = x.shape
    inner = heads * dim_head

    # Pad the output width to a 128-lane multiple only when D is already >= 128;
    # for small D the write amplification costs more than masked stores save.
    Dp = D if D < 128 else _round_up(D, 128)

    # bf16 matmul operands unless the caller already passes a low-precision dtype.
    compute_dtype = x.dtype if x.dtype in (jnp.bfloat16, jnp.float16) else jnp.bfloat16

    # Right-matmul layouts for the kernel; weights stored in the compute dtype.
    wqkv_r = jnp.asarray(w_qkv).T.astype(compute_dtype)                 # [D, 3*inner]
    wo_r = jnp.asarray(w_out).T.astype(compute_dtype)                   # [inner, D]
    bo_r = jnp.asarray(b_out, jnp.float32).reshape(1, D)                # [1, D] (f32 add)
    if Dp != D:
        wo_r = jnp.pad(wo_r, ((0, 0), (0, Dp - D)))
        bo_r = jnp.pad(bo_r, ((0, 0), (0, Dp - D)))

    # ---- generation-aware VMEM budget (v5e/v6e 128 MiB, v7x 64 MiB per core) ----
    try:
        vmem_cap = int(pltpu.get_tpu_info().vmem_capacity_bytes)
    except Exception:
        vmem_cap = 64 * 1024 * 1024                                     # conservative
    budget = min(int(0.75 * vmem_cap), 100 * 1024 * 1024)

    isz_in = x.dtype.itemsize
    isz_c = jnp.dtype(compute_dtype).itemsize

    def step_bytes(bt):
        # Pipeline blocks (double-buffered activations, <=2x weights) + f32 intermediates.
        blocks = 2 * bt * N * D * isz_in + 2 * bt * N * Dp * isz_in
        blocks += 2 * ((D * 3 * inner + inner * Dp) * isz_c + Dp * 4)
        interm = bt * N * 3 * inner * (4 + isz_c)          # qkv f32 + q/k/v compute copies
        interm += 2 * bt * heads * N * N * 4               # scores + probs (f32)
        interm += bt * N * inner * 4 + bt * N * Dp * 4     # attn out + projection accum
        return blocks + interm

    Bt = _pick_batch_tile(B, N, budget=budget, step_bytes=step_bytes)
    grid = (B // Bt,)
    vmem_limit = int(min(budget, max(16 * 1024 * 1024, int(1.5 * step_bytes(Bt)))))

    def build(batched_heads, single_buffer_weights):
        kernel = functools.partial(mha_kernel, heads=heads, dim_head=dim_head,
                                   batched_heads=batched_heads,
                                   compute_dtype=compute_dtype)
        # Constant-index_map weights: single-buffering frees VMEM (notably on v7x).
        wkw = dict(pipeline_mode=pl.Buffered(1)) if single_buffer_weights else {}
        in_specs = [
            pl.BlockSpec((Bt, N, D), lambda b: (b, 0, 0)),               # x batch tile
            pl.BlockSpec((D, 3 * inner), lambda b: (0, 0), **wkw),       # fused W_qkv
            pl.BlockSpec((inner, Dp), lambda b: (0, 0), **wkw),          # fused W_out
            pl.BlockSpec((1, Dp), lambda b: (0, 0), **wkw),              # bias
        ]
        return pl.pallas_call(
            kernel,
            out_shape=jax.ShapeDtypeStruct((B, N, Dp), x.dtype),
            grid_spec=pltpu.PrefetchScalarGridSpec(
                num_scalar_prefetch=0,
                grid=grid,
                in_specs=in_specs,
                out_specs=pl.BlockSpec((Bt, N, Dp), lambda b: (b, 0, 0)),
            ),
            compiler_params=pltpu.CompilerParams(
                dimension_semantics=("parallel",),
                vmem_limit_bytes=vmem_limit,
            ),
        )

    cache_key = (B, N, D, heads, dim_head, str(x.dtype))
    order = _CONFIG_ORDER
    if cache_key in _config_cache:
        pref = _config_cache[cache_key]
        order = (pref,) + tuple(c for c in _CONFIG_ORDER if c != pref)

    out_padded, last_err = None, None
    for cfg in order:
        try:
            out_padded = build(*cfg)(x, wqkv_r, wo_r, bo_r)
            _config_cache[cache_key] = cfg
            break
        except Exception as e:  # Mosaic lowering gaps (multi-batch-dim dot, Buffered(1))
            last_err = e
    if out_padded is None:
        raise last_err

    return out_padded[:, :, :D] if Dp != D else out_padded


def make_params(key, dim, heads, dim_head):
    """Deterministic synthetic parameters matching the nn.Linear layouts of the module."""
    inner = heads * dim_head
    k1, k2, k3 = jax.random.split(key, 3)
    w_qkv = jax.random.normal(k1, (3 * inner, dim), jnp.float32) * 0.05   # to_qkv.weight
    w_out = jax.random.normal(k2, (dim, inner), jnp.float32) * 0.05       # to_out[0].weight
    b_out = jax.random.normal(k3, (dim,), jnp.float32) * 0.05             # to_out[0].bias
    return w_qkv, w_out, b_out


def reference_mha(x, w_qkv, w_out, b_out, heads, dim_head):
    """Pure-JAX f32 reference matching the PyTorch forward (dropout=0)."""
    B, N, D = x.shape
    inner = heads * dim_head
    qkv = x @ w_qkv.T                                        # [B, N, 3*inner]
    q, k, v = jnp.split(qkv, 3, axis=-1)
    split_heads = lambda t: t.reshape(B, N, heads, dim_head).transpose(0, 2, 1, 3)
    q, k, v = split_heads(q), split_heads(k), split_heads(v)
    dots = jnp.einsum("bhnd,bhmd->bhnm", q, k) * (dim_head ** -0.5)
    attn = jax.nn.softmax(dots, axis=-1)
    out = jnp.einsum("bhnm,bhmd->bhnd", attn, v)
    out = out.transpose(0, 2, 1, 3).reshape(B, N, inner)
    return out @ w_out.T + b_out


if __name__ == "__main__":
    B, N, dim = 2, 8, 32
    heads, dim_head = 4, 16

    key = jax.random.PRNGKey(0)
    kx, kp = jax.random.split(key)
    x = jax.random.normal(kx, (B, N, dim), jnp.float32)
    w_qkv, w_out, b_out = make_params(kp, dim, heads, dim_head)

    out = multi_head_attention(x, w_qkv, w_out, b_out, heads=heads, dim_head=dim_head)
    out = jax.block_until_ready(out)

    ref = reference_mha(x, w_qkv, w_out, b_out, heads, dim_head)
    assert out.shape == (B, N, dim)
    # Tolerance covers bf16 MXU operands (f32 accumulation) and the EUP approximate
    # reciprocal in the softmax denominator.
    assert jnp.allclose(out, ref, atol=2e-2, rtol=2e-2), "mismatch vs pure-JAX reference"

    print("KERNEL_OK")
</pallas_src>

<mosaic_0001>
module attributes {stable_mosaic.version = 11 : i64} {
  func.func @mha_kernel(%arg0: i32, %arg1: memref<1x8x32xf32, #tpu.memory_space<vmem>>, %arg2: memref<32x192xbf16, #tpu.memory_space<vmem>>, %arg3: memref<64x32xbf16, #tpu.memory_space<vmem>>, %arg4: memref<1x32xf32, #tpu.memory_space<vmem>>, %arg5: memref<1x8x32xf32, #tpu.memory_space<vmem>>) attributes {dimension_semantics = [#tpu.dimension_semantics<parallel>], iteration_bounds = array<i64: 2>, scalar_prefetch = 0 : i64, scratch_operands = 0 : i64, tpu.core_type = #tpu.core_type<tc>, window_params = [{transform_indices = @transform_0, window_bounds = array<i64: 1, 8, 32>}, {pipeline_mode = #tpu.pipeline_mode<synchronous>, transform_indices = @transform_1, window_bounds = array<i64: 32, 192>}, {pipeline_mode = #tpu.pipeline_mode<synchronous>, transform_indices = @transform_2, window_bounds = array<i64: 64, 32>}, {pipeline_mode = #tpu.pipeline_mode<synchronous>, transform_indices = @transform_3, window_bounds = array<i64: 1, 32>}, {transform_indices = @transform_4, window_bounds = array<i64: 1, 8, 32>}]} {
    %c0 = arith.constant 0 : index
    %c0_0 = arith.constant 0 : index
    %c0_1 = arith.constant 0 : index
    %0 = vector.load %arg1[%c0, %c0_0, %c0_1] : memref<1x8x32xf32, #tpu.memory_space<vmem>>, vector<1x8x32xf32>
    %1 = arith.truncf %0 : vector<1x8x32xf32> to vector<1x8x32xbf16>
    %2 = vector.shape_cast %1 : vector<1x8x32xbf16> to vector<8x32xbf16>
    %c0_2 = arith.constant 0 : index
    %c0_3 = arith.constant 0 : index
    %3 = vector.load %arg2[%c0_2, %c0_3] : memref<32x192xbf16, #tpu.memory_space<vmem>>, vector<32x192xbf16>
    %cst = arith.constant dense<0.000000e+00> : vector<8x192xf32>
    %4 = tpu.matmul %2, %3, %cst {dimension_numbers = #tpu.dot_dimension_numbers<[1], [0], [0], [1], [0, 0, 1, 1], [], []>} : vector<8x32xbf16>, vector<32x192xbf16>, vector<8x192xf32> -> vector<8x192xf32>
    %5 = vector.shape_cast %4 : vector<8x192xf32> to vector<1x8x192xf32>
    %6 = vector.extract_strided_slice %5 {offsets = [0, 0, 0], sizes = [1, 8, 64], strides = [1, 1, 1]} : vector<1x8x192xf32> to vector<1x8x64xf32>
    %cst_4 = arith.constant 2.500000e-01 : f32
    %7 = vector.broadcast %cst_4 : f32 to vector<1x8x64xf32>
    %8 = arith.mulf %6, %7 : vector<1x8x64xf32>
    %9 = arith.truncf %8 : vector<1x8x64xf32> to vector<1x8x64xbf16>
    %10 = vector.extract_strided_slice %5 {offsets = [0, 0, 64], sizes = [1, 8, 64], strides = [1, 1, 1]} : vector<1x8x192xf32> to vector<1x8x64xf32>
    %11 = arith.truncf %10 : vector<1x8x64xf32> to vector<1x8x64xbf16>
    %12 = vector.extract_strided_slice %5 {offsets = [0, 0, 128], sizes = [1, 8, 64], strides = [1, 1, 1]} : vector<1x8x192xf32> to vector<1x8x64xf32>
    %13 = arith.truncf %12 : vector<1x8x64xf32> to vector<1x8x64xbf16>
    %14 = vector.extract_strided_slice %9 {offsets = [0, 0, 0], sizes = [1, 8, 16], strides = [1, 1, 1]} : vector<1x8x64xbf16> to vector<1x8x16xbf16>
    %15 = vector.extract_strided_slice %11 {offsets = [0, 0, 0], sizes = [1, 8, 16], strides = [1, 1, 1]} : vector<1x8x64xbf16> to vector<1x8x16xbf16>
    %16 = vector.extract_strided_slice %13 {offsets = [0, 0, 0], sizes = [1, 8, 16], strides = [1, 1, 1]} : vector<1x8x64xbf16> to vector<1x8x16xbf16>
    "tpu.trace_start"() <{level = 10 : i32, message = "bnd,bmd->bnm"}> : () -> ()
    %cst_5 = arith.constant dense<0.000000e+00> : vector<1x8x8xf32>
    %17 = tpu.matmul %14, %15, %cst_5 {dimension_numbers = #tpu.dot_dimension_numbers<[2], [2], [1], [1], [0, 0, 0, 1, 1, 1], [0], [0]>} : vector<1x8x16xbf16>, vector<1x8x16xbf16>, vector<1x8x8xf32> -> vector<1x8x8xf32>
    "tpu.trace_stop"() : () -> ()
    %cst_6 = arith.constant dense<0xFF800000> : vector<1x8xf32>
    %18 = vector.multi_reduction <maximumf>, %17, %cst_6 [2] : vector<1x8x8xf32> to vector<1x8xf32>
    %19 = vector.shape_cast %18 : vector<1x8xf32> to vector<1x8x1xf32>
    %20 = vector.broadcast %19 : vector<1x8x1xf32> to vector<1x8x8xf32>
    %21 = arith.subf %17, %20 : vector<1x8x8xf32>
    %22 = math.exp %21 : vector<1x8x8xf32>
    %cst_7 = arith.constant dense<0.000000e+00> : vector<1x8xf32>
    %23 = vector.multi_reduction <add>, %22, %cst_7 [2] : vector<1x8x8xf32> to vector<1x8xf32>
    %24 = vector.shape_cast %23 : vector<1x8xf32> to vector<1x8x1xf32>
    %25 = tpu.reciprocal %24 {approx = true} : vector<1x8x1xf32> -> vector<1x8x1xf32>
    %26 = vector.broadcast %25 : vector<1x8x1xf32> to vector<1x8x8xf32>
    %27 = arith.mulf %22, %26 : vector<1x8x8xf32>
    %28 = arith.truncf %27 : vector<1x8x8xf32> to vector<1x8x8xbf16>
    "tpu.trace_start"() <{level = 10 : i32, message = "bnm,bmd->bnd"}> : () -> ()
    %cst_8 = arith.constant dense<0.000000e+00> : vector<1x8x16xf32>
    %29 = tpu.matmul %28, %16, %cst_8 {dimension_numbers = #tpu.dot_dimension_numbers<[2], [1], [1], [2], [0, 0, 0, 1, 1, 2], [0], [0]>} : vector<1x8x8xbf16>, vector<1x8x16xbf16>, vector<1x8x16xf32> -> vector<1x8x16xf32>
    "tpu.trace_stop"() : () -> ()
    %30 = vector.extract_strided_slice %9 {offsets = [0, 0, 16], sizes = [1, 8, 16], strides = [1, 1, 1]} : vector<1x8x64xbf16> to vector<1x8x16xbf16>
    %31 = vector.extract_strided_slice %11 {offsets = [0, 0, 16], sizes = [1, 8, 16], strides = [1, 1, 1]} : vector<1x8x64xbf16> to vector<1x8x16xbf16>
    %32 = vector.extract_strided_slice %13 {offsets = [0, 0, 16], sizes = [1, 8, 16], strides = [1, 1, 1]} : vector<1x8x64xbf16> to vector<1x8x16xbf16>
    "tpu.trace_start"() <{level = 10 : i32, message = "bnd,bmd->bnm"}> : () -> ()
    %cst_9 = arith.constant dense<0.000000e+00> : vector<1x8x8xf32>
    %33 = tpu.matmul %30, %31, %cst_9 {dimension_numbers = #tpu.dot_dimension_numbers<[2], [2], [1], [1], [0, 0, 0, 1, 1, 1], [0], [0]>} : vector<1x8x16xbf16>, vector<1x8x16xbf16>, vector<1x8x8xf32> -> vector<1x8x8xf32>
    "tpu.trace_stop"() : () -> ()
    %cst_10 = arith.constant dense<0xFF800000> : vector<1x8xf32>
    %34 = vector.multi_reduction <maximumf>, %33, %cst_10 [2] : vector<1x8x8xf32> to vector<1x8xf32>
    %35 = vector.shape_cast %34 : vector<1x8xf32> to vector<1x8x1xf32>
    %36 = vector.broadcast %35 : vector<1x8x1xf32> to vector<1x8x8xf32>
    %37 = arith.subf %33, %36 : vector<1x8x8xf32>
    %38 = math.exp %37 : vector<1x8x8xf32>
    %cst_11 = arith.constant dense<0.000000e+00> : vector<1x8xf32>
    %39 = vector.multi_reduction <add>, %38, %cst_11 [2] : vector<1x8x8xf32> to vector<1x8xf32>
    %40 = vector.shape_cast %39 : vector<1x8xf32> to vector<1x8x1xf32>
    %41 = tpu.reciprocal %40 {approx = true} : vector<1x8x1xf32> -> vector<1x8x1xf32>
    %42 = vector.broadcast %41 : vector<1x8x1xf32> to vector<1x8x8xf32>
    %43 = arith.mulf %38, %42 : vector<1x8x8xf32>
    %44 = arith.truncf %43 : vector<1x8x8xf32> to vector<1x8x8xbf16>
    "tpu.trace_start"() <{level = 10 : i32, message = "bnm,bmd->bnd"}> : () -> ()
    %cst_12 = arith.constant dense<0.000000e+00> : vector<1x8x16xf32>
    %45 = tpu.matmul %44, %32, %cst_12 {dimension_numbers = #tpu.dot_dimension_numbers<[2], [1], [1], [2], [0, 0, 0, 1, 1, 2], [0], [0]>} : vector<1x8x8xbf16>, vector<1x8x16xbf16>, vector<1x8x16xf32> -> vector<1x8x16xf32>
    "tpu.trace_stop"() : () -> ()
    %46 = vector.extract_strided_slice %9 {offsets = [0, 0, 32], sizes = [1, 8, 16], strides = [1, 1, 1]} : vector<1x8x64xbf16> to vector<1x8x16xbf16>
    %47 = vector.extract_strided_slice %11 {offsets = [0, 0, 32], sizes = [1, 8, 16], strides = [1, 1, 1]} : vector<1x8x64xbf16> to vector<1x8x16xbf16>
    %48 = vector.extract_strided_slice %13 {offsets = [0, 0, 32], sizes = [1, 8, 16], strides = [1, 1, 1]} : vector<1x8x64xbf16> to vector<1x8x16xbf16>
    "tpu.trace_start"() <{level = 10 : i32, message = "bnd,bmd->bnm"}> : () -> ()
    %cst_13 = arith.constant dense<0.000000e+00> : vector<1x8x8xf32>
    %49 = tpu.matmul %46, %47, %cst_13 {dimension_numbers = #tpu.dot_dimension_numbers<[2], [2], [1], [1], [0, 0, 0, 1, 1, 1], [0], [0]>} : vector<1x8x16xbf16>, vector<1x8x16xbf16>, vector<1x8x8xf32> -> vector<1x8x8xf32>
    "tpu.trace_stop"() : () -> ()
    %cst_14 = arith.constant dense<0xFF800000> : vector<1x8xf32>
    %50 = vector.multi_reduction <maximumf>, %49, %cst_14 [2] : vector<1x8x8xf32> to vector<1x8xf32>
    %51 = vector.shape_cast %50 : vector<1x8xf32> to vector<1x8x1xf32>
    %52 = vector.broadcast %51 : vector<1x8x1xf32> to vector<1x8x8xf32>
    %53 = arith.subf %49, %52 : vector<1x8x8xf32>
    %54 = math.exp %53 : vector<1x8x8xf32>
    %cst_15 = arith.constant dense<0.000000e+00> : vector<1x8xf32>
    %55 = vector.multi_reduction <add>, %54, %cst_15 [2] : vector<1x8x8xf32> to vector<1x8xf32>
    %56 = vector.shape_cast %55 : vector<1x8xf32> to vector<1x8x1xf32>
    %57 = tpu.reciprocal %56 {approx = true} : vector<1x8x1xf32> -> vector<1x8x1xf32>
    %58 = vector.broadcast %57 : vector<1x8x1xf32> to vector<1x8x8xf32>
    %59 = arith.mulf %54, %58 : vector<1x8x8xf32>
    %60 = arith.truncf %59 : vector<1x8x8xf32> to vector<1x8x8xbf16>
    "tpu.trace_start"() <{level = 10 : i32, message = "bnm,bmd->bnd"}> : () -> ()
    %cst_16 = arith.constant dense<0.000000e+00> : vector<1x8x16xf32>
    %61 = tpu.matmul %60, %48, %cst_16 {dimension_numbers = #tpu.dot_dimension_numbers<[2], [1], [1], [2], [0, 0, 0, 1, 1, 2], [0], [0]>} : vector<1x8x8xbf16>, vector<1x8x16xbf16>, vector<1x8x16xf32> -> vector<1x8x16xf32>
    "tpu.trace_stop"() : () -> ()
    %62 = vector.extract_strided_slice %9 {offsets = [0, 0, 48], sizes = [1, 8, 16], strides = [1, 1, 1]} : vector<1x8x64xbf16> to vector<1x8x16xbf16>
    %63 = vector.extract_strided_slice %11 {offsets = [0, 0, 48], sizes = [1, 8, 16], strides = [1, 1, 1]} : vector<1x8x64xbf16> to vector<1x8x16xbf16>
    %64 = vector.extract_strided_slice %13 {offsets = [0, 0, 48], sizes = [1, 8, 16], strides = [1, 1, 1]} : vector<1x8x64xbf16> to vector<1x8x16xbf16>
    "tpu.trace_start"() <{level = 10 : i32, message = "bnd,bmd->bnm"}> : () -> ()
    %cst_17 = arith.constant dense<0.000000e+00> : vector<1x8x8xf32>
    %65 = tpu.matmul %62, %63, %cst_17 {dimension_numbers = #tpu.dot_dimension_numbers<[2], [2], [1], [1], [0, 0, 0, 1, 1, 1], [0], [0]>} : vector<1x8x16xbf16>, vector<1x8x16xbf16>, vector<1x8x8xf32> -> vector<1x8x8xf32>
    "tpu.trace_stop"() : () -> ()
    %cst_18 = arith.constant dense<0xFF800000> : vector<1x8xf32>
    %66 = vector.multi_reduction <maximumf>, %65, %cst_18 [2] : vector<1x8x8xf32> to vector<1x8xf32>
    %67 = vector.shape_cast %66 : vector<1x8xf32> to vector<1x8x1xf32>
    %68 = vector.broadcast %67 : vector<1x8x1xf32> to vector<1x8x8xf32>
    %69 = arith.subf %65, %68 : vector<1x8x8xf32>
    %70 = math.exp %69 : vector<1x8x8xf32>
    %cst_19 = arith.constant dense<0.000000e+00> : vector<1x8xf32>
    %71 = vector.multi_reduction <add>, %70, %cst_19 [2] : vector<1x8x8xf32> to vector<1x8xf32>
    %72 = vector.shape_cast %71 : vector<1x8xf32> to vector<1x8x1xf32>
    %73 = tpu.reciprocal %72 {approx = true} : vector<1x8x1xf32> -> vector<1x8x1xf32>
    %74 = vector.broadcast %73 : vector<1x8x1xf32> to vector<1x8x8xf32>
    %75 = arith.mulf %70, %74 : vector<1x8x8xf32>
    %76 = arith.truncf %75 : vector<1x8x8xf32> to vector<1x8x8xbf16>
    "tpu.trace_start"() <{level = 10 : i32, message = "bnm,bmd->bnd"}> : () -> ()
    %cst_20 = arith.constant dense<0.000000e+00> : vector<1x8x16xf32>
    %77 = tpu.matmul %76, %64, %cst_20 {dimension_numbers = #tpu.dot_dimension_numbers<[2], [1], [1], [2], [0, 0, 0, 1, 1, 2], [0], [0]>} : vector<1x8x8xbf16>, vector<1x8x16xbf16>, vector<1x8x16xf32> -> vector<1x8x16xf32>
    "tpu.trace_stop"() : () -> ()
    %78 = tpu.concatenate %29, %45, %61, %77 in 2 : vector<1x8x16xf32>, vector<1x8x16xf32>, vector<1x8x16xf32>, vector<1x8x16xf32> -> vector<1x8x64xf32>
    %79 = vector.shape_cast %78 : vector<1x8x64xf32> to vector<8x64xf32>
    %80 = arith.truncf %79 : vector<8x64xf32> to vector<8x64xbf16>
    %c0_21 = arith.constant 0 : index
    %c0_22 = arith.constant 0 : index
    %81 = vector.load %arg3[%c0_21, %c0_22] : memref<64x32xbf16, #tpu.memory_space<vmem>>, vector<64x32xbf16>
    %cst_23 = arith.constant dense<0.000000e+00> : vector<8x32xf32>
    %82 = tpu.matmul %80, %81, %cst_23 {dimension_numbers = #tpu.dot_dimension_numbers<[1], [0], [0], [1], [0, 0, 1, 1], [], []>} : vector<8x64xbf16>, vector<64x32xbf16>, vector<8x32xf32> -> vector<8x32xf32>
    %c0_24 = arith.constant 0 : index
    %c0_25 = arith.constant 0 : index
    %83 = vector.load %arg4[%c0_24, %c0_25] : memref<1x32xf32, #tpu.memory_space<vmem>>, vector<1x32xf32>
    %84 = vector.broadcast %83 : vector<1x32xf32> to vector<8x32xf32>
    %85 = arith.addf %82, %84 : vector<8x32xf32>
    %86 = vector.shape_cast %85 : vector<8x32xf32> to vector<1x8x32xf32>
    %c0_26 = arith.constant 0 : index
    %c0_27 = arith.constant 0 : index
    %c0_28 = arith.constant 0 : index
    %87 = vector.load %arg5[%c0_26, %c0_27, %c0_28] : memref<1x8x32xf32, #tpu.memory_space<vmem>>, vector<1x8x32xf32>
    tpu.vector_store %arg5[%c0_26, %c0_27, %c0_28], %86 {strides = array<i32>} : memref<1x8x32xf32, #tpu.memory_space<vmem>>, vector<1x8x32xf32>,
    return
  }
  func.func @transform_0(%arg0: i32) -> (i32, i32, i32) {
    %c0_i32 = arith.constant 0 : i32
    %c0_i32_0 = arith.constant 0 : i32
    %c0_i32_1 = arith.constant 0 : i32
    return %arg0, %c0_i32, %c0_i32_0 : i32, i32, i32
  }
  func.func @transform_1(%arg0: i32) -> (i32, i32) {
    %c0_i32 = arith.constant 0 : i32
    %c0_i32_0 = arith.constant 0 : i32
    %c0_i32_1 = arith.constant 0 : i32
    return %c0_i32, %c0_i32_0 : i32, i32
  }
  func.func @transform_2(%arg0: i32) -> (i32, i32) {
    %c0_i32 = arith.constant 0 : i32
    %c0_i32_0 = arith.constant 0 : i32
    %c0_i32_1 = arith.constant 0 : i32
    return %c0_i32, %c0_i32_0 : i32, i32
  }
  func.func @transform_3(%arg0: i32) -> (i32, i32) {
    %c0_i32 = arith.constant 0 : i32
    %c0_i32_0 = arith.constant 0 : i32
    %c0_i32_1 = arith.constant 0 : i32
    return %c0_i32, %c0_i32_0 : i32, i32
  }
  func.func @transform_4(%arg0: i32) -> (i32, i32, i32) {
    %c0_i32 = arith.constant 0 : i32
    %c0_i32_0 = arith.constant 0 : i32
    %c0_i32_1 = arith.constant 0 : i32
    return %arg0, %c0_i32, %c0_i32_0 : i32, i32, i32
  }
}

module attributes {stable_mosaic.version = 11 : i64} {
  func.func @mha_kernel(%arg0: i32, %arg1: memref<1x8x32xf32, #tpu.memory_space<vmem>>, %arg2: memref<32x192xbf16, #tpu.memory_space<vmem>>, %arg3: memref<64x32xbf16, #tpu.memory_space<vmem>>, %arg4: memref<1x32xf32, #tpu.memory_space<vmem>>, %arg5: memref<1x8x32xf32, #tpu.memory_space<vmem>>) attributes {dimension_semantics = [#tpu.dimension_semantics<parallel>], iteration_bounds = array<i64: 2>, scalar_prefetch = 0 : i64, scratch_operands = 0 : i64, tpu.core_type = #tpu.core_type<tc>, window_params = [{transform_indices = @transform_0, window_bounds = array<i64: 1, 8, 32>}, {pipeline_mode = #tpu.pipeline_mode<synchronous>, transform_indices = @transform_1, window_bounds = array<i64: 32, 192>}, {pipeline_mode = #tpu.pipeline_mode<synchronous>, transform_indices = @transform_2, window_bounds = array<i64: 64, 32>}, {pipeline_mode = #tpu.pipeline_mode<synchronous>, transform_indices = @transform_3, window_bounds = array<i64: 1, 32>}, {transform_indices = @transform_4, window_bounds = array<i64: 1, 8, 32>}]} {
    %c0 = arith.constant 0 : index
    %c0_0 = arith.constant 0 : index
    %c0_1 = arith.constant 0 : index
    %0 = vector.load %arg1[%c0, %c0_0, %c0_1] : memref<1x8x32xf32, #tpu.memory_space<vmem>>, vector<1x8x32xf32>
    %1 = arith.truncf %0 : vector<1x8x32xf32> to vector<1x8x32xbf16>
    %2 = vector.shape_cast %1 : vector<1x8x32xbf16> to vector<8x32xbf16>
    %c0_2 = arith.constant 0 : index
    %c0_3 = arith.constant 0 : index
    %3 = vector.load %arg2[%c0_2, %c0_3] : memref<32x192xbf16, #tpu.memory_space<vmem>>, vector<32x192xbf16>
    %cst = arith.constant dense<0.000000e+00> : vector<8x192xf32>
    %4 = tpu.matmul %2, %3, %cst {dimension_numbers = #tpu.dot_dimension_numbers<[1], [0], [0], [1], [0, 0, 1, 1], [], []>} : vector<8x32xbf16>, vector<32x192xbf16>, vector<8x192xf32> -> vector<8x192xf32>
    %5 = vector.shape_cast %4 : vector<8x192xf32> to vector<1x8x192xf32>
    %6 = vector.extract_strided_slice %5 {offsets = [0, 0, 0], sizes = [1, 8, 64], strides = [1, 1, 1]} : vector<1x8x192xf32> to vector<1x8x64xf32>
    %cst_4 = arith.constant 2.500000e-01 : f32
    %7 = vector.broadcast %cst_4 : f32 to vector<1x8x64xf32>
    %8 = arith.mulf %6, %7 : vector<1x8x64xf32>
    %9 = arith.truncf %8 : vector<1x8x64xf32> to vector<1x8x64xbf16>
    %10 = vector.extract_strided_slice %5 {offsets = [0, 0, 64], sizes = [1, 8, 64], strides = [1, 1, 1]} : vector<1x8x192xf32> to vector<1x8x64xf32>
    %11 = arith.truncf %10 : vector<1x8x64xf32> to vector<1x8x64xbf16>
    %12 = vector.extract_strided_slice %5 {offsets = [0, 0, 128], sizes = [1, 8, 64], strides = [1, 1, 1]} : vector<1x8x192xf32> to vector<1x8x64xf32>
    %13 = arith.truncf %12 : vector<1x8x64xf32> to vector<1x8x64xbf16>
    %14 = vector.extract_strided_slice %9 {offsets = [0, 0, 0], sizes = [1, 8, 16], strides = [1, 1, 1]} : vector<1x8x64xbf16> to vector<1x8x16xbf16>
    %15 = vector.extract_strided_slice %11 {offsets = [0, 0, 0], sizes = [1, 8, 16], strides = [1, 1, 1]} : vector<1x8x64xbf16> to vector<1x8x16xbf16>
    %16 = vector.extract_strided_slice %13 {offsets = [0, 0, 0], sizes = [1, 8, 16], strides = [1, 1, 1]} : vector<1x8x64xbf16> to vector<1x8x16xbf16>
    "tpu.trace_start"() <{level = 10 : i32, message = "bnd,bmd->bnm"}> : () -> ()
    %cst_5 = arith.constant dense<0.000000e+00> : vector<1x8x8xf32>
    %17 = tpu.matmul %14, %15, %cst_5 {dimension_numbers = #tpu.dot_dimension_numbers<[2], [2], [1], [1], [0, 0, 0, 1, 1, 1], [0], [0]>} : vector<1x8x16xbf16>, vector<1x8x16xbf16>, vector<1x8x8xf32> -> vector<1x8x8xf32>
    "tpu.trace_stop"() : () -> ()
    %cst_6 = arith.constant dense<0xFF800000> : vector<1x8xf32>
    %18 = vector.multi_reduction <maximumf>, %17, %cst_6 [2] : vector<1x8x8xf32> to vector<1x8xf32>
    %19 = vector.shape_cast %18 : vector<1x8xf32> to vector<1x8x1xf32>
    %20 = vector.broadcast %19 : vector<1x8x1xf32> to vector<1x8x8xf32>
    %21 = arith.subf %17, %20 : vector<1x8x8xf32>
    %22 = math.exp %21 : vector<1x8x8xf32>
    %cst_7 = arith.constant dense<0.000000e+00> : vector<1x8xf32>
    %23 = vector.multi_reduction <add>, %22, %cst_7 [2] : vector<1x8x8xf32> to vector<1x8xf32>
    %24 = vector.shape_cast %23 : vector<1x8xf32> to vector<1x8x1xf32>
    %25 = tpu.reciprocal %24 {approx = true} : vector<1x8x1xf32> -> vector<1x8x1xf32>
    %26 = vector.broadcast %25 : vector<1x8x1xf32> to vector<1x8x8xf32>
    %27 = arith.mulf %22, %26 : vector<1x8x8xf32>
    %28 = arith.truncf %27 : vector<1x8x8xf32> to vector<1x8x8xbf16>
    "tpu.trace_start"() <{level = 10 : i32, message = "bnm,bmd->bnd"}> : () -> ()
    %cst_8 = arith.constant dense<0.000000e+00> : vector<1x8x16xf32>
    %29 = tpu.matmul %28, %16, %cst_8 {dimension_numbers = #tpu.dot_dimension_numbers<[2], [1], [1], [2], [0, 0, 0, 1, 1, 2], [0], [0]>} : vector<1x8x8xbf16>, vector<1x8x16xbf16>, vector<1x8x16xf32> -> vector<1x8x16xf32>
    "tpu.trace_stop"() : () -> ()
    %30 = vector.extract_strided_slice %9 {offsets = [0, 0, 16], sizes = [1, 8, 16], strides = [1, 1, 1]} : vector<1x8x64xbf16> to vector<1x8x16xbf16>
    %31 = vector.extract_strided_slice %11 {offsets = [0, 0, 16], sizes = [1, 8, 16], strides = [1, 1, 1]} : vector<1x8x64xbf16> to vector<1x8x16xbf16>
    %32 = vector.extract_strided_slice %13 {offsets = [0, 0, 16], sizes = [1, 8, 16], strides = [1, 1, 1]} : vector<1x8x64xbf16> to vector<1x8x16xbf16>
    "tpu.trace_start"() <{level = 10 : i32, message = "bnd,bmd->bnm"}> : () -> ()
    %cst_9 = arith.constant dense<0.000000e+00> : vector<1x8x8xf32>
    %33 = tpu.matmul %30, %31, %cst_9 {dimension_numbers = #tpu.dot_dimension_numbers<[2], [2], [1], [1], [0, 0, 0, 1, 1, 1], [0], [0]>} : vector<1x8x16xbf16>, vector<1x8x16xbf16>, vector<1x8x8xf32> -> vector<1x8x8xf32>
    "tpu.trace_stop"() : () -> ()
    %cst_10 = arith.constant dense<0xFF800000> : vector<1x8xf32>
    %34 = vector.multi_reduction <maximumf>, %33, %cst_10 [2] : vector<1x8x8xf32> to vector<1x8xf32>
    %35 = vector.shape_cast %34 : vector<1x8xf32> to vector<1x8x1xf32>
    %36 = vector.broadcast %35 : vector<1x8x1xf32> to vector<1x8x8xf32>
    %37 = arith.subf %33, %36 : vector<1x8x8xf32>
    %38 = math.exp %37 : vector<1x8x8xf32>
    %cst_11 = arith.constant dense<0.000000e+00> : vector<1x8xf32>
    %39 = vector.multi_reduction <add>, %38, %cst_11 [2] : vector<1x8x8xf32> to vector<1x8xf32>
    %40 = vector.shape_cast %39 : vector<1x8xf32> to vector<1x8x1xf32>
    %41 = tpu.reciprocal %40 {approx = true} : vector<1x8x1xf32> -> vector<1x8x1xf32>
    %42 = vector.broadcast %41 : vector<1x8x1xf32> to vector<1x8x8xf32>
    %43 = arith.mulf %38, %42 : vector<1x8x8xf32>
    %44 = arith.truncf %43 : vector<1x8x8xf32> to vector<1x8x8xbf16>
    "tpu.trace_start"() <{level = 10 : i32, message = "bnm,bmd->bnd"}> : () -> ()
    %cst_12 = arith.constant dense<0.000000e+00> : vector<1x8x16xf32>
    %45 = tpu.matmul %44, %32, %cst_12 {dimension_numbers = #tpu.dot_dimension_numbers<[2], [1], [1], [2], [0, 0, 0, 1, 1, 2], [0], [0]>} : vector<1x8x8xbf16>, vector<1x8x16xbf16>, vector<1x8x16xf32> -> vector<1x8x16xf32>
    "tpu.trace_stop"() : () -> ()
    %46 = vector.extract_strided_slice %9 {offsets = [0, 0, 32], sizes = [1, 8, 16], strides = [1, 1, 1]} : vector<1x8x64xbf16> to vector<1x8x16xbf16>
    %47 = vector.extract_strided_slice %11 {offsets = [0, 0, 32], sizes = [1, 8, 16], strides = [1, 1, 1]} : vector<1x8x64xbf16> to vector<1x8x16xbf16>
    %48 = vector.extract_strided_slice %13 {offsets = [0, 0, 32], sizes = [1, 8, 16], strides = [1, 1, 1]} : vector<1x8x64xbf16> to vector<1x8x16xbf16>
    "tpu.trace_start"() <{level = 10 : i32, message = "bnd,bmd->bnm"}> : () -> ()
    %cst_13 = arith.constant dense<0.000000e+00> : vector<1x8x8xf32>
    %49 = tpu.matmul %46, %47, %cst_13 {dimension_numbers = #tpu.dot_dimension_numbers<[2], [2], [1], [1], [0, 0, 0, 1, 1, 1], [0], [0]>} : vector<1x8x16xbf16>, vector<1x8x16xbf16>, vector<1x8x8xf32> -> vector<1x8x8xf32>
    "tpu.trace_stop"() : () -> ()
    %cst_14 = arith.constant dense<0xFF800000> : vector<1x8xf32>
    %50 = vector.multi_reduction <maximumf>, %49, %cst_14 [2] : vector<1x8x8xf32> to vector<1x8xf32>
    %51 = vector.shape_cast %50 : vector<1x8xf32> to vector<1x8x1xf32>
    %52 = vector.broadcast %51 : vector<1x8x1xf32> to vector<1x8x8xf32>
    %53 = arith.subf %49, %52 : vector<1x8x8xf32>
    %54 = math.exp %53 : vector<1x8x8xf32>
    %cst_15 = arith.constant dense<0.000000e+00> : vector<1x8xf32>
    %55 = vector.multi_reduction <add>, %54, %cst_15 [2] : vector<1x8x8xf32> to vector<1x8xf32>
    %56 = vector.shape_cast %55 : vector<1x8xf32> to vector<1x8x1xf32>
    %57 = tpu.reciprocal %56 {approx = true} : vector<1x8x1xf32> -> vector<1x8x1xf32>
    %58 = vector.broadcast %57 : vector<1x8x1xf32> to vector<1x8x8xf32>
    %59 = arith.mulf %54, %58 : vector<1x8x8xf32>
    %60 = arith.truncf %59 : vector<1x8x8xf32> to vector<1x8x8xbf16>
    "tpu.trace_start"() <{level = 10 : i32, message = "bnm,bmd->bnd"}> : () -> ()
    %cst_16 = arith.constant dense<0.000000e+00> : vector<1x8x16xf32>
    %61 = tpu.matmul %60, %48, %cst_16 {dimension_numbers = #tpu.dot_dimension_numbers<[2], [1], [1], [2], [0, 0, 0, 1, 1, 2], [0], [0]>} : vector<1x8x8xbf16>, vector<1x8x16xbf16>, vector<1x8x16xf32> -> vector<1x8x16xf32>
    "tpu.trace_stop"() : () -> ()
    %62 = vector.extract_strided_slice %9 {offsets = [0, 0, 48], sizes = [1, 8, 16], strides = [1, 1, 1]} : vector<1x8x64xbf16> to vector<1x8x16xbf16>
    %63 = vector.extract_strided_slice %11 {offsets = [0, 0, 48], sizes = [1, 8, 16], strides = [1, 1, 1]} : vector<1x8x64xbf16> to vector<1x8x16xbf16>
    %64 = vector.extract_strided_slice %13 {offsets = [0, 0, 48], sizes = [1, 8, 16], strides = [1, 1, 1]} : vector<1x8x64xbf16> to vector<1x8x16xbf16>
    "tpu.trace_start"() <{level = 10 : i32, message = "bnd,bmd->bnm"}> : () -> ()
    %cst_17 = arith.constant dense<0.000000e+00> : vector<1x8x8xf32>
    %65 = tpu.matmul %62, %63, %cst_17 {dimension_numbers = #tpu.dot_dimension_numbers<[2], [2], [1], [1], [0, 0, 0, 1, 1, 1], [0], [0]>} : vector<1x8x16xbf16>, vector<1x8x16xbf16>, vector<1x8x8xf32> -> vector<1x8x8xf32>
    "tpu.trace_stop"() : () -> ()
    %cst_18 = arith.constant dense<0xFF800000> : vector<1x8xf32>
    %66 = vector.multi_reduction <maximumf>, %65, %cst_18 [2] : vector<1x8x8xf32> to vector<1x8xf32>
    %67 = vector.shape_cast %66 : vector<1x8xf32> to vector<1x8x1xf32>
    %68 = vector.broadcast %67 : vector<1x8x1xf32> to vector<1x8x8xf32>
    %69 = arith.subf %65, %68 : vector<1x8x8xf32>
    %70 = math.exp %69 : vector<1x8x8xf32>
    %cst_19 = arith.constant dense<0.000000e+00> : vector<1x8xf32>
    %71 = vector.multi_reduction <add>, %70, %cst_19 [2] : vector<1x8x8xf32> to vector<1x8xf32>
    %72 = vector.shape_cast %71 : vector<1x8xf32> to vector<1x8x1xf32>
    %73 = tpu.reciprocal %72 {approx = true} : vector<1x8x1xf32> -> vector<1x8x1xf32>
    %74 = vector.broadcast %73 : vector<1x8x1xf32> to vector<1x8x8xf32>
    %75 = arith.mulf %70, %74 : vector<1x8x8xf32>
    %76 = arith.truncf %75 : vector<1x8x8xf32> to vector<1x8x8xbf16>
    "tpu.trace_start"() <{level = 10 : i32, message = "bnm,bmd->bnd"}> : () -> ()
    %cst_20 = arith.constant dense<0.000000e+00> : vector<1x8x16xf32>
    %77 = tpu.matmul %76, %64, %cst_20 {dimension_numbers = #tpu.dot_dimension_numbers<[2], [1], [1], [2], [0, 0, 0, 1, 1, 2], [0], [0]>} : vector<1x8x8xbf16>, vector<1x8x16xbf16>, vector<1x8x16xf32> -> vector<1x8x16xf32>
    "tpu.trace_stop"() : () -> ()
    %78 = tpu.concatenate %29, %45, %61, %77 in 2 : vector<1x8x16xf32>, vector<1x8x16xf32>, vector<1x8x16xf32>, vector<1x8x16xf32> -> vector<1x8x64xf32>
    %79 = vector.shape_cast %78 : vector<1x8x64xf32> to vector<8x64xf32>
    %80 = arith.truncf %79 : vector<8x64xf32> to vector<8x64xbf16>
    %c0_21 = arith.constant 0 : index
    %c0_22 = arith.constant 0 : index
    %81 = vector.load %arg3[%c0_21, %c0_22] : memref<64x32xbf16, #tpu.memory_space<vmem>>, vector<64x32xbf16>
    %cst_23 = arith.constant dense<0.000000e+00> : vector<8x32xf32>
    %82 = tpu.matmul %80, %81, %cst_23 {dimension_numbers = #tpu.dot_dimension_numbers<[1], [0], [0], [1], [0, 0, 1, 1], [], []>} : vector<8x64xbf16>, vector<64x32xbf16>, vector<8x32xf32> -> vector<8x32xf32>
    %c0_24 = arith.constant 0 : index
    %c0_25 = arith.constant 0 : index
    %83 = vector.load %arg4[%c0_24, %c0_25] : memref<1x32xf32, #tpu.memory_space<vmem>>, vector<1x32xf32>
    %84 = vector.broadcast %83 : vector<1x32xf32> to vector<8x32xf32>
    %85 = arith.addf %82, %84 : vector<8x32xf32>
    %86 = vector.shape_cast %85 : vector<8x32xf32> to vector<1x8x32xf32>
    %c0_26 = arith.constant 0 : index
    %c0_27 = arith.constant 0 : index
    %c0_28 = arith.constant 0 : index
    %87 = vector.load %arg5[%c0_26, %c0_27, %c0_28] : memref<1x8x32xf32, #tpu.memory_space<vmem>>, vector<1x8x32xf32>
    tpu.vector_store %arg5[%c0_26, %c0_27, %c0_28], %86 {strides = array<i32>} : memref<1x8x32xf32, #tpu.memory_space<vmem>>, vector<1x8x32xf32>,
    return
  }
  func.func @transform_0(%arg0: i32) -> (i32, i32, i32) {
    %c0_i32 = arith.constant 0 : i32
    %c0_i32_0 = arith.constant 0 : i32
    %c0_i32_1 = arith.constant 0 : i32
    return %arg0, %c0_i32, %c0_i32_0 : i32, i32, i32
  }
  func.func @transform_1(%arg0: i32) -> (i32, i32) {
    %c0_i32 = arith.constant 0 : i32
    %c0_i32_0 = arith.constant 0 : i32
    %c0_i32_1 = arith.constant 0 : i32
    return %c0_i32, %c0_i32_0 : i32, i32
  }
  func.func @transform_2(%arg0: i32) -> (i32, i32) {
    %c0_i32 = arith.constant 0 : i32
    %c0_i32_0 = arith.constant 0 : i32
    %c0_i32_1 = arith.constant 0 : i32
    return %c0_i32, %c0_i32_0 : i32, i32
  }
  func.func @transform_3(%arg0: i32) -> (i32, i32) {
    %c0_i32 = arith.constant 0 : i32
    %c0_i32_0 = arith.constant 0 : i32
    %c0_i32_1 = arith.constant 0 : i32
    return %c0_i32, %c0_i32_0 : i32, i32
  }
  func.func @transform_4(%arg0: i32) -> (i32, i32, i32) {
    %c0_i32 = arith.constant 0 : i32
    %c0_i32_0 = arith.constant 0 : i32
    %c0_i32_1 = arith.constant 0 : i32
    return %arg0, %c0_i32, %c0_i32_0 : i32, i32, i32
  }
}

</mosaic_0001>

<bundles_post_ra>
// kernel: tpu_custom_call.1
= control target key start
LH: loop header
LB: loop body
LE: loop exit
PB: predicated region body
PF: predicated region fallthrough
CT: control target
= control target key end

     0   :  { %9 = vsyncpa [#allocation3], 0  ;;  %s1370_s0 = inlined_call_operand.vmem [shape: f32[2,8,32], index: 0, kind: input, shape index: {}]   ;;  %s1371_s1 = inlined_call_operand.vmem [shape: bf16[32,192], index: 1, kind: input, shape index: {}]   ;;  %s1372_s2 = inlined_call_operand.vmem [shape: bf16[64,32], index: 2, kind: input, shape index: {}]   ;;  %s1373_s3 = inlined_call_operand.vmem [shape: f32[1,32], index: 3, kind: input, shape index: {}]   ;;  %s1374_s4 = inlined_call_operand.hbm [shape: f32[2,8,32], index: 4, kind: output, shape index: {}]  }
   0x1   :  { %11 = vsyncpa [#allocation3 + $0x1], 0  ;;  %s1168_s15 = smov 0   ;;  %s1170_s16 = smov 0  }
   0x2   :  { %s1172_s17 = smov 0   ;;  %s1174_s18 = smov 0  }
   0x3 LB: > { %s1189_s19 = sadd.s32 4294967295, %s1130_s18   ;;  %s885_s20 = sadd.s32 4294967294, %s1130_s18   ;;  %s1130_s18 = sphi %s1174_s18, %s1380_s18   ;;  %s1126_s17 = sphi %s1172_s17, %s1379_s17   ;;  %s1122_s16 = sphi %s1170_s16, %s1378_s16   ;;  %s1118_s15 = sphi %s1168_s15, %s1377_s15  }
   0x4   : > { %s1193_s21 = sadd.s32 1, %s1130_s18   ;;  %s113_s22 = sadd.s32 1, %s1126_s17 }
   0x5   : > { %s110_s23 = ssub.s32 %s1130_s18, %s1193_s21  ;;  %p123_p0 = scmp.ne.s32.totalorder %s1126_s17, %s1122_s16 }
   0x6   : > { %p111_p1 = scmp.eq.s32.totalorder %s110_s23, 0  ;;  %p124_p2 = scmp.eq.s32.totalorder %s1189_s19, 1 }
   0x7   : > { %p129_p3 = scmp.ne.s32.totalorder %s1122_s16, %s1118_s15  ;;  %p130_p4 = scmp.eq.s32.totalorder %s885_s20, 1 }
   0x8   : > { %s1204_s24 = scalar_select %p111_p1, %s1126_s17, %s113_s22  }
   0x9   : > { %p1206_p5 = por %p124_p2, %p123_p0  ;;  %p1210_p6 = por %p130_p4, %p129_p3 }
   0xa   : > { %p888_p7 = scmp.ge.s32.totalorder %s1130_s18, 1  ;;  %p164_p8 = scmp.lt.s32.totalorder %s1130_s18, 3 }
   0xc   : > { %p165_p9 = pnand %p888_p7, %p164_p8 }
   0xd   : > { %p189_p10 = scmp.lt.s32.totalorder (!%p165_p9), %s1189_s19, 1  ;;  %s1135_s14 = smov (!%p165_p9), 64  }
   0xe   : > { %168 = sbr.rel (%p165_p9) target bundleno = 1434 (0x59a), region = 36  ;;  %s1136_s20 = smov (!%p165_p9), 112  }
   0xf   : > { %s1137_s22 = smov (!%p165_p9), 48   ;;  %s1138_s23 = smov (!%p165_p9), 32  }
  0x10   : > { %s1139_s27 = smov (!%p165_p9), 96   ;;  %s1140_s28 = smov (!%p165_p9), 16  }
  0x11   : > { %s1141_s29 = smov (!%p165_p9), 80   ;;  %s186_s12 = sand.u32 (!%p165_p9), 1, %s1122_s16  }
  0x12   : > { %s813_s5 = scalar_lea.sflag (!%p165_p9), [#allocation3], %s186_s12  ;;  %s1142_s6 = smov (!%p165_p9), [#allocation2]  }
  0x13   : > { %v1044_v0 = vld [vmem:[%s1371_s1 + $0x14] ss:$8 sps:$4 sm:$0xff]   ;;  %v1046_v1 = vld [vmem:[%s1371_s1 + $0x10] ss:$8 sps:$4 sm:$0xff]   ;;  %v1132_v2 = vmov 0   ;;  %s190_s9 = scalar_select %p189_p10, %s1189_s19, 1 }
  0x14   : > { %256 = vmatprep.mubr.bf16.mxu0 %v1132_v2  ;;  %236 = vmatprep.subr.bf16.mxu0 %v1044_v0  ;;  %v1047_v3 = vld [vmem:[%s1371_s1 + $0x4] ss:$8 sps:$4 sm:$0xff]   ;;  %v1049_v4 = vld [vmem:[%s1371_s1] ss:$8 sps:$4 sm:$0xff]   ;;  %vm220_vm0 = vcmask 261120   ;;  %v1133_v7 = vmov 0.0  }
  0x15   : > { %237 = vmatpush1.bf16.msra.mxu0 %v1046_v1  ;;  %s890_s10 = sshll.u32 %s190_s9, 3  ;;  %935 = vmatprep.subr.bf16.mxu1 %v1133_v7  ;;  %vm1134_vm1 = vmmov 0   ;;  %vm335_vm2 = vcmask 1043456   ;;  %vm272_vm3 = vcmask 130048   ;;  %vm319_vm4 = vcmask 64512   ;;  %s1074_s7 = sshll.u32 %s1142_s6, 4  ;;  %s1075_s7 = int_to_ptr.vmem [resolvable:$false] %s1074_s7 }
  0x16   : > { %238 = vmatprep.subr.bf16.mxu0 %v1047_v3  ;;  %s192_s13 = scalar_lea.vmem %s1370_s0, %s890_s10  ;;  %937 = vmatprep.mubr.msk.bf16.mxu1 %vm1134_vm1, %v1133_v7  ;;  %vm725_vm5 = vcmask 392192   ;;  %vm767_vm6 = vcmask 523264   ;;  %s1076_s8 = scalar_lea.vmem %s1075_s7, 256 }
  0x17   : > { %v194_v5 = vld [vmem:[%s192_s13] sm:$0xff]  ;;  %s889_s13 = sshll.u32 %s186_s12, 3 }
  0x18   : > { %v195_v6 = vpack.c.bf16 %v194_v5, %v194_v5 }
  0x19   : > { %239 = vmatpush1.bf16.msra.mxu0 %v1049_v4 }
  0x1a   : > { %941 = vmatprep.subr.bf16.mxu0 %v1133_v7 }
  0x1c   : > { %895 = vmatmul.mubr.msk.bf16.vlgmr.msra.gmra.mxu0 %vm220_vm0, %v195_v6 }
  0x1d   : > { %943 = vmatprep.mubr.msk.bf16.mxu0 %vm1134_vm1, %v1133_v7 }
  0xdc   : > { %v258_v8 = vpop.f32.mrf.mxu0 }
  0xdd   : > { %v265_v9 = vmul.f32 0.25, %v258_v8  ;;  %v267_v10 = vpack.c.bf16 %v258_v8, %v258_v8 }
  0xde   : > { %v260_v11 = vpop.f32.mrf.mxu0 }
  0xdf   : > { %v266_v12 = vpack.c.bf16 %v265_v9, %v265_v9  ;;  %v1240_v13 = vpack.c.bf16 %v260_v11, %v260_v11  ;;  %270 = vrot.lane.b32.xlu0 %v267_v10, %s1135_s14 }
  0xe0   : > { %v262_v14 = vpop.f32.mrf.mxu0 }
  0xe1   : > { %380 = vrot.lane.b32.xlu1 %v266_v12, %s1136_s20  ;;  %v337_v15 = vsel %vm335_vm2, %v1240_v13, 0 }
  0xe2   : > { %v263_v16 = vpop.f32.mrf.mxu0  ;;  %942 = vmatpush3.bf16.msra.mxu0 %v337_v15 }
  0xe3   : > { %382 = vrot.lane.b32.xlu0 %v267_v10, %s1137_s22  ;;  %953 = vmatprep.subr.bf16.mxu0 %v1133_v7 }
  0xe5   : > { %493 = vrot.lane.b32.xlu1 %v267_v10, %s1138_s23 }
  0xe7   : > { %491 = vrot.lane.b32.xlu0 %v266_v12, %s1139_s27 }
  0xe9   : > { %603 = vrot.lane.b32.xlu1 %v267_v10, %s1140_s28 }
  0xeb   : > { %601 = vrot.lane.b32.xlu0 %v266_v12, %s1141_s29 }
 0x151   : > { %v271_v17 = vpop.permute.xlu0 %270 }
 0x152   : > { %v277_v18 = vsel %vm272_vm3, %v271_v17, 0 }
 0x153   : > { %936 = vmatpush3.bf16.xpose.msra.mxu1 %v277_v18  ;;  %v381_v20 = vpop.permute.xlu1 %380 }
 0x154   : > { %947 = vmatprep.subr.bf16.mxu1 %v1133_v7 }
 0x155   : > { %v383_v19 = vpop.permute.xlu0 %382 }
 0x156   : > { %v388_v21 = vsel %vm272_vm3, %v383_v19, 0 }
 0x157   : > { %v494_v22 = vpop.permute.xlu1 %493 }
 0x158   : > { %v499_v23 = vsel %vm272_vm3, %v494_v22, 0 }
 0x159   : > { %v492_v25 = vpop.permute.xlu0 %491 }
 0x15a   : > { %938 = vmatmul.mubr.msk.bf16.vlgmr.msra.gmra.mxu1 %vm272_vm3, %v266_v12 }
 0x15b   : > { %948 = vmatpush3.bf16.xpose.msra.mxu1 %v388_v21  ;;  %949 = vmatprep.mubr.msk.bf16.mxu1 %vm1134_vm1, %v1133_v7  ;;  %v604_v24 = vpop.permute.xlu1 %603 }
 0x15c   : > { %959 = vmatprep.subr.bf16.mxu1 %v1133_v7  ;;  %v609_v26 = vsel %vm272_vm3, %v604_v24, 0 }
 0x15d   : > { %v602_v27 = vpop.permute.xlu0 %601 }
 0x162   : > { %950 = vmatmul.mubr.msk.bf16.vlgmr.msra.gmra.mxu1 %vm272_vm3, %v381_v20 }
 0x163   : > { %960 = vmatpush3.bf16.xpose.msra.mxu1 %v499_v23  ;;  %961 = vmatprep.mubr.msk.bf16.mxu1 %vm1134_vm1, %v1133_v7 }
 0x164   : > { %971 = vmatprep.subr.bf16.mxu1 %v1133_v7 }
 0x16a   : > { %962 = vmatmul.mubr.msk.bf16.vlgmr.msra.gmra.mxu1 %vm272_vm3, %v492_v25 }
 0x16b   : > { %972 = vmatpush3.bf16.xpose.msra.mxu1 %v609_v26  ;;  %973 = vmatprep.mubr.msk.bf16.mxu1 %vm1134_vm1, %v1133_v7 }
 0x16c   : > { %983 = vmatprep.subr.bf16.mxu1 %v1133_v7 }
 0x172   : > { %974 = vmatmul.mubr.msk.bf16.vlgmr.msra.gmra.mxu1 %vm272_vm3, %v602_v27 }
 0x173   : > { %991 = vmatprep.mubr.msk.bf16.mxu1 %vm1134_vm1, %v1133_v7 }
 0x21a   : > { %v313_v28 = vpop.f32.mrf.mxu1 }
 0x21b   : > { %v320_v29 = vsel %vm319_vm4, %v313_v28, -inf }
 0x21c   : > { %321 = vmax.xlane.f32.xlu1 %v320_v29  ;;  %v939_v30 = vpop.f32.mrf.mxu1 }
 0x21d   : > { %v1050_v30 = vld [vmem:[%s1372_s2 + $0x18] sm:$0xff]  }
 0x21e   : > { %v316_v31 = vpop.f32.mrf.mxu1  ;;  %984 = vmatpush3.bf16.msra.mxu1 %v1050_v30 }
 0x21f   : > { %985 = vmatprep.subr.bf16.mxu1 %v1133_v7 }
 0x220   : > { %v940_v32 = vpop.f32.mrf.mxu1 }
 0x221   : > { %v1051_v32 = vld [vmem:[%s1372_s2 + $0x10] sm:$0xff]  }
 0x222   : > { %v424_v33 = vpop.f32.mrf.mxu1  ;;  %986 = vmatpush3.bf16.msra.mxu1 %v1051_v32 }
 0x223   : > { %v430_v34 = vsel %vm319_vm4, %v424_v33, -inf  ;;  %987 = vmatprep.subr.bf16.mxu1 %v1133_v7 }
 0x224   : > { %431 = vmax.xlane.f32.xlu0 %v430_v34  ;;  %v951_v35 = vpop.f32.mrf.mxu1 }
 0x225   : > { %v1052_v35 = vld [vmem:[%s1372_s2 + $0x8] sm:$0xff]  }
 0x226   : > { %v427_v36 = vpop.f32.mrf.mxu1  ;;  %988 = vmatpush3.bf16.msra.mxu1 %v1052_v35 }
 0x227   : > { %989 = vmatprep.subr.bf16.mxu1 %v1133_v7 }
 0x228   : > { %v952_v37 = vpop.f32.mrf.mxu1 }
 0x22a   : > { %v535_v38 = vpop.f32.mrf.mxu1 }
 0x22b   : > { %v541_v39 = vsel %vm319_vm4, %v535_v38, -inf }
 0x22c   : > { %542 = vmax.xlane.f32.xlu0 %v541_v39  ;;  %v963_v40 = vpop.f32.mrf.mxu1 }
 0x22e   : > { %v538_v41 = vpop.f32.mrf.mxu1 }
 0x230   : > { %v964_v42 = vpop.f32.mrf.mxu1 }
 0x231   : > { %v1053_v42 = vld [vmem:[%s1372_s2] sm:$0xff]  }
 0x232   : > { %v645_v43 = vpop.f32.mrf.mxu1  ;;  %990 = vmatpush3.bf16.msra.mxu1 %v1053_v42 }
 0x233   : > { %v651_v44 = vsel %vm319_vm4, %v645_v43, -inf }
 0x234   : > { %652 = vmax.xlane.f32.xlu1 %v651_v44  ;;  %v975_v45 = vpop.f32.mrf.mxu1 }
 0x236   : > { %v648_v46 = vpop.f32.mrf.mxu1 }
 0x238   : > { %v976_v47 = vpop.f32.mrf.mxu1 }
 0x2a5   : > { %v322_v48 = vpop.xlane.xlu1 %321 }
 0x2a6   : > { %v323_v49 = vsub.f32 %v313_v28, %v322_v48 }
 0x2a8   : > { %v324_v50 = vmul.f32 1.442695, %v323_v49 }
 0x2aa   : > { %1054 = vpow2.f32 %v324_v50 }
 0x2ad   : > { %v432_v51 = vpop.xlane.xlu0 %431 }
 0x2ae   : > { %v433_v52 = vsub.f32 %v424_v33, %v432_v51 }
 0x2b0   : > { %v434_v53 = vmul.f32 1.442695, %v433_v52 }
 0x2b2   : > { %1056 = vpow2.f32 %v434_v53  ;;  %v904_v53 = vld [vmem:[%s1373_s3] ss:$0 sm:$0xff] }
 0x2b5   : > { %v543_v54 = vpop.xlane.xlu0 %542 }
 0x2b6   : > { %v544_v55 = vsub.f32 %v535_v38, %v543_v54 }
 0x2b7   : > { %v1055_v56 = vpop.eup %1054 }
 0x2b8   : > { %v545_v57 = vmul.f32 1.442695, %v544_v55  ;;  %v326_v58 = vsel %vm319_vm4, %v1055_v56, 0.0 }
 0x2b9   : > { %327 = vadd.xlane.f32.xlu0 %v326_v58 }
 0x2ba   : > { %1058 = vpow2.f32 %v545_v57 }
 0x2bd   : > { %v653_v63 = vpop.xlane.xlu1 %652 }
 0x2be   : > { %v654_v0 = vsub.f32 %v645_v43, %v653_v63 }
 0x2bf   : > { %v1057_v59 = vpop.eup %1056 }
 0x2c0   : > { %v436_v60 = vsel %vm319_vm4, %v1057_v59, 0.0  ;;  %v655_v1 = vmul.f32 1.442695, %v654_v0 }
 0x2c1   : > { %437 = vadd.xlane.f32.xlu1 %v436_v60 }
 0x2c2   : > { %1060 = vpow2.f32 %v655_v1 }
 0x2c7   : > { %v1059_v61 = vpop.eup %1058 }
 0x2c8   : > { %v547_v62 = vsel %vm319_vm4, %v1059_v61, 0.0 }
 0x2c9   : > { %548 = vadd.xlane.f32.xlu0 %v547_v62 }
 0x2cf   : > { %v1061_v2 = vpop.eup %1060 }
 0x2d0   : > { %v657_v3 = vsel %vm319_vm4, %v1061_v2, 0.0 }
 0x2d2   : > { %553 = vrot.lane.b32.xlu1 %v1240_v13, %s1139_s27 }
 0x2df   : > { %443 = vrot.lane.b32.xlu0 %v1240_v13, %s1136_s20 }
 0x2f6   : > { %658 = vadd.xlane.f32.xlu1 %v657_v3 }
 0x307   : > { %663 = vrot.lane.b32.xlu1 %v1240_v13, %s1141_s29 }
 0x342   : > { %v328_v4 = vpop.xlane.xlu0 %327 }
 0x343   : > { %1062 = vrcp.f32 %v328_v4 }
 0x34a   : > { %v438_v5 = vpop.xlane.xlu1 %437 }
 0x34b   : > { %1064 = vrcp.f32 %v438_v5 }
 0x34e   : > { %v554_v15 = vpop.permute.xlu1 %553 }
 0x34f   : > { %v559_v17 = vsel %vm335_vm2, %v554_v15, 0 }
 0x350   : > { %v1063_v6 = vpop.eup %1062 }
 0x351   : > { %v330_v8 = vmul.f32 %v1063_v6, %v1055_v56 }
 0x352   : > { %v549_v9 = vpop.xlane.xlu0 %548 }
 0x353   : > { %1066 = vrcp.f32 %v549_v9  ;;  %v331_v10 = vpack.c.bf16 %v330_v8, %v330_v8 }
 0x355   : > { %944 = vmatmul.mubr.msk.bf16.vlgmr.msra.gmra.mxu0 %vm319_vm4, %v331_v10 }
 0x356   : > { %v444_v11 = vpop.permute.xlu0 %443  ;;  %955 = vmatprep.mubr.msk.bf16.mxu0 %vm1134_vm1, %v1133_v7 }
 0x357   : > { %v449_v12 = vsel %vm335_vm2, %v444_v11, 0 }
 0x358   : > { %v1065_v14 = vpop.eup %1064  ;;  %954 = vmatpush3.bf16.msra.mxu0 %v449_v12 }
 0x359   : > { %965 = vmatprep.subr.bf16.mxu0 %v1133_v7  ;;  %v440_v13 = vmul.f32 %v1065_v14, %v1057_v59 }
 0x35b   : > { %v441_v16 = vpack.c.bf16 %v440_v13, %v440_v13 }
 0x35d   : > { %956 = vmatmul.mubr.msk.bf16.vlgmr.msra.gmra.mxu0 %vm319_vm4, %v441_v16 }
 0x35e   : > { %966 = vmatpush3.bf16.msra.mxu0 %v559_v17  ;;  %967 = vmatprep.mubr.msk.bf16.mxu0 %vm1134_vm1, %v1133_v7 }
 0x35f   : > { %977 = vmatprep.subr.bf16.mxu0 %v1133_v7 }
 0x360   : > { %v1067_v18 = vpop.eup %1066 }
 0x361   : > { %v551_v19 = vmul.f32 %v1067_v18, %v1059_v61 }
 0x363   : > { %v552_v20 = vpack.c.bf16 %v551_v19, %v551_v19 }
 0x365   : > { %968 = vmatmul.mubr.msk.bf16.vlgmr.msra.gmra.mxu0 %vm319_vm4, %v552_v20 }
 0x366   : > { %979 = vmatprep.mubr.msk.bf16.mxu0 %vm1134_vm1, %v1133_v7 }
 0x37f   : > { %v659_v21 = vpop.xlane.xlu1 %658 }
 0x380   : > { %1068 = vrcp.f32 %v659_v21 }
 0x383   : > { %v664_v22 = vpop.permute.xlu1 %663 }
 0x384   : > { %v669_v23 = vsel %vm335_vm2, %v664_v22, 0 }
 0x385   : > { %978 = vmatpush3.bf16.msra.mxu0 %v669_v23 }
 0x38d   : > { %v1069_v24 = vpop.eup %1068 }
 0x38e   : > { %v661_v25 = vmul.f32 %v1069_v24, %v1061_v2 }
 0x390   : > { %v662_v26 = vpack.c.bf16 %v661_v25, %v661_v25 }
 0x392   : > { %980 = vmatmul.mubr.msk.bf16.vlgmr.msra.gmra.mxu0 %vm319_vm4, %v662_v26 }
 0x415   : > { %v373_v27 = vpop.f32.mrf.mxu0 }
 0x417   : > { %v945_v28 = vpop.f32.mrf.mxu0 }
 0x419   : > { %v376_v29 = vpop.f32.mrf.mxu0 }
 0x41b   : > { %v946_v31 = vpop.f32.mrf.mxu0 }
 0x41d   : > { %v485_v33 = vpop.f32.mrf.mxu0 }
 0x41e   : > { %712 = vrot.lane.b32.xlu0 %v485_v33, %s1140_s28 }
 0x41f   : > { %v957_v34 = vpop.f32.mrf.mxu0 }
 0x421   : > { %v488_v36 = vpop.f32.mrf.mxu0 }
 0x423   : > { %v958_v37 = vpop.f32.mrf.mxu0 }
 0x425   : > { %v595_v38 = vpop.f32.mrf.mxu0 }
 0x426   : > { %716 = vrot.lane.b32.xlu1 %v595_v38, %s1138_s23  ;;  %s188_s23 = scalar_lea.vmem [#allocation2], %s889_s13 }
 0x427   : > { %v969_v39 = vpop.f32.mrf.mxu0  ;;  %s826_s27 = sshll.u32 %s188_s23, 4  ;;  %s1330_s27 = int_to_ptr.vmem [resolvable:$true] %s826_s27 }
 0x428   : > { %p1077_p0 = scmp.lt.s32.totalorder %s1330_s27, %s1075_s7 }
 0x429   : > { %v598_v40 = vpop.f32.mrf.mxu0 }
 0x42b   : > { %v970_v41 = vpop.f32.mrf.mxu0 }
 0x452   : > { %v705_v43 = vpop.f32.mrf.mxu0 }
 0x453   : > { %720 = vrot.lane.b32.xlu0 %v705_v43, %s1137_s22  ;;  %s911_s22 = sshll.u32 %s1189_s19, 7  ;;  %s1070_s19 = scalar_lea.vmem %s1330_s27, 128 }
 0x454   : > { %v981_v44 = vpop.f32.mrf.mxu0  ;;  %s1328_s30 = scalar_lea.hbm %s1374_s4, %s911_s22  ;;  %p1071_p11 = scmp.ne.s32.totalorder %s1330_s27, %s1070_s19 }
 0x455   : > { %p1078_p1 = scmp.lt.s32.totalorder %s1076_s8, %s1070_s19 }
 0x456   : > { %v708_v45 = vpop.f32.mrf.mxu0  ;;  %p1072_p12 = pnand %p1071_p11, %p1206_p5 }
 0x457   : > { %p1079_p2 = por %p1078_p1, %p1077_p0 }
 0x458   : > { %v982_v46 = vpop.f32.mrf.mxu0  ;;  %p1073_p13 = pneg %p1072_p12 }
 0x45a   : > { %p1080_p3 = pnand %p1079_p2, %p1073_p13 }
 0x490   : > { %v713_v7 = vpop.permute.xlu0 %712 }
 0x491   : > { %v723_v48 = vsel %vm272_vm3, %v373_v27, %v713_v7 }
 0x498   : > { %v717_v47 = vpop.permute.xlu1 %716 }
 0x499   : > { %v724_v49 = vsel %vm220_vm0, %v723_v48, %v717_v47 }
 0x4c5   : > { %v721_v50 = vpop.permute.xlu0 %720 }
 0x4c6   : > { %v726_v51 = vsel %vm725_vm5, %v724_v49, %v721_v50 }
 0x4c7   : > { %v727_v52 = vpack.c.bf16 %v726_v51, %v726_v51 }
 0x4c9   : > { %992 = vmatmul.mubr.msk.bf16.vlgmr.msra.gmra.mxu1 %vm767_vm6, %v727_v52 }
 0x589   : > { %v805_v54 = vpop.f32.mrf.mxu1 }
 0x58a   : > { %v806_v55 = vadd.f32 %v904_v53, %v805_v54 }
 0x58b   : > { %v993_v56 = vpop.f32.mrf.mxu1 }
 0x58c   : > { %811 = vst.msk [vmem:[%s188_s23] sm:$0xff] %vm220_vm0, %v806_v55 }
 0x58d   : > { %v808_v57 = vpop.f32.mrf.mxu1 }
 0x58e   : > { %1083 = shalt.err (!%p1080_p3)
}
 0x58f   : > { %s1084_s9 = scalar_lea.hbm %s1328_s30, 128  ;;  %s1088_s12 = scalar_lea.hbm %s1374_s4, 256 }
 0x590   : > { %p1085_p4 = scmp.ne.s32.totalorder %s1328_s30, %s1084_s9  ;;  %p1089_p9 = scmp.lt.s32.totalorder %s1328_s30, %s1374_s4 }
 0x591   : > { %p1090_p10 = scmp.lt.s32.totalorder %s1088_s12, %s1084_s9 }
 0x592   : > { %p1086_p7 = pnand %p1085_p4, %p1206_p5 }
 0x593   : > { %p1091_p11 = por %p1090_p10, %p1089_p9 }
 0x594   : > { %p1087_p8 = pneg %p1086_p7 }
 0x596   : > { %p1092_p12 = pnand %p1091_p11, %p1087_p8 }
 0x598   : > { %1095 = shalt.err (!%p1092_p12)
}
 0x599   : > { %995 = dma.vmem_to_hbm [thread:$0]  (%p1206_p5), %s1330_s27, 128, %s1328_s30, %s813_s5   ;;  %v994_v58 = vpop.f32.mrf.mxu1 }
 0x59a PF: > { %p1001_p13 = scmp.ge.s32.totalorder %s1130_s18, 2  ;;  %s838_s20 = sand.u32 1, %s1118_s15  }
 0x59b   : > { %s839_s22 = scalar_lea.sflag [#allocation3], %s838_s20 }
 0x59c   : > { %p998_p0 = pnand %p1001_p13, %p1210_p6 }
 0x59e   : > { %p999_p1 = pneg %p998_p0 }
 0x5a0   : > { %1113 = dma.done.wait (%p999_p1), %s839_s22, 128  }
 0x5a1   : > { %1115 = vsyncadd (%p999_p1), %s839_s22, 4294967168  ;;  %p14_p2 = scmp.ge.s32.totalorder %s1193_s21, 4   ;;  %s1377_s15 = smov %s1122_s16 }
 0x5a2   : > { %s1378_s16 = smov %s1126_s17  ;;  %s1379_s17 = smov %s1204_s24 }
 0x5a3   : > { %s1380_s18 = smov %s1193_s21  ;;  %16 = sbr.rel (!%p14_p2) target bundleno = 3 (0x3), region = 71 }
 0x5a8   :  { %844 = vsyncpa [#allocation3], 1 }
 0x5a9   :  { %846 = vsyncpa [#allocation3 + $0x1], 1 }

// kernel: tpu_custom_call.1
= control target key start
LH: loop header
LB: loop body
LE: loop exit
PB: predicated region body
PF: predicated region fallthrough
CT: control target
= control target key end

     0   :  { %9 = vsyncpa [#allocation3], 0  ;;  %s1370_s0 = inlined_call_operand.vmem [shape: f32[2,8,32], index: 0, kind: input, shape index: {}]   ;;  %s1371_s1 = inlined_call_operand.vmem [shape: bf16[32,192], index: 1, kind: input, shape index: {}]   ;;  %s1372_s2 = inlined_call_operand.vmem [shape: bf16[64,32], index: 2, kind: input, shape index: {}]   ;;  %s1373_s3 = inlined_call_operand.vmem [shape: f32[1,32], index: 3, kind: input, shape index: {}]   ;;  %s1374_s4 = inlined_call_operand.hbm [shape: f32[2,8,32], index: 4, kind: output, shape index: {}]  }
   0x1   :  { %11 = vsyncpa [#allocation3 + $0x1], 0  ;;  %s1168_s15 = smov 0   ;;  %s1170_s16 = smov 0  }
   0x2   :  { %s1172_s17 = smov 0   ;;  %s1174_s18 = smov 0  }
   0x3 LB: > { %s1189_s19 = sadd.s32 4294967295, %s1130_s18   ;;  %s885_s20 = sadd.s32 4294967294, %s1130_s18   ;;  %s1130_s18 = sphi %s1174_s18, %s1380_s18   ;;  %s1126_s17 = sphi %s1172_s17, %s1379_s17   ;;  %s1122_s16 = sphi %s1170_s16, %s1378_s16   ;;  %s1118_s15 = sphi %s1168_s15, %s1377_s15  }
   0x4   : > { %s1193_s21 = sadd.s32 1, %s1130_s18   ;;  %s113_s22 = sadd.s32 1, %s1126_s17 }
   0x5   : > { %s110_s23 = ssub.s32 %s1130_s18, %s1193_s21  ;;  %p123_p0 = scmp.ne.s32.totalorder %s1126_s17, %s1122_s16 }
   0x6   : > { %p111_p1 = scmp.eq.s32.totalorder %s110_s23, 0  ;;  %p124_p2 = scmp.eq.s32.totalorder %s1189_s19, 1 }
   0x7   : > { %p129_p3 = scmp.ne.s32.totalorder %s1122_s16, %s1118_s15  ;;  %p130_p4 = scmp.eq.s32.totalorder %s885_s20, 1 }
   0x8   : > { %s1204_s24 = scalar_select %p111_p1, %s1126_s17, %s113_s22  }
   0x9   : > { %p1206_p5 = por %p124_p2, %p123_p0  ;;  %p1210_p6 = por %p130_p4, %p129_p3 }
   0xa   : > { %p888_p7 = scmp.ge.s32.totalorder %s1130_s18, 1  ;;  %p164_p8 = scmp.lt.s32.totalorder %s1130_s18, 3 }
   0xc   : > { %p165_p9 = pnand %p888_p7, %p164_p8 }
   0xd   : > { %p189_p10 = scmp.lt.s32.totalorder (!%p165_p9), %s1189_s19, 1  ;;  %s1135_s14 = smov (!%p165_p9), 64  }
   0xe   : > { %168 = sbr.rel (%p165_p9) target bundleno = 1434 (0x59a), region = 36  ;;  %s1136_s20 = smov (!%p165_p9), 112  }
   0xf   : > { %s1137_s22 = smov (!%p165_p9), 48   ;;  %s1138_s23 = smov (!%p165_p9), 32  }
  0x10   : > { %s1139_s27 = smov (!%p165_p9), 96   ;;  %s1140_s28 = smov (!%p165_p9), 16  }
  0x11   : > { %s1141_s29 = smov (!%p165_p9), 80   ;;  %s186_s12 = sand.u32 (!%p165_p9), 1, %s1122_s16  }
  0x12   : > { %s813_s5 = scalar_lea.sflag (!%p165_p9), [#allocation3], %s186_s12  ;;  %s1142_s6 = smov (!%p165_p9), [#allocation2]  }
  0x13   : > { %v1044_v0 = vld [vmem:[%s1371_s1 + $0x14] ss:$8 sps:$4 sm:$0xff]   ;;  %v1046_v1 = vld [vmem:[%s1371_s1 + $0x10] ss:$8 sps:$4 sm:$0xff]   ;;  %v1132_v2 = vmov 0   ;;  %s190_s9 = scalar_select %p189_p10, %s1189_s19, 1 }
  0x14   : > { %256 = vmatprep.mubr.bf16.mxu0 %v1132_v2  ;;  %236 = vmatprep.subr.bf16.mxu0 %v1044_v0  ;;  %v1047_v3 = vld [vmem:[%s1371_s1 + $0x4] ss:$8 sps:$4 sm:$0xff]   ;;  %v1049_v4 = vld [vmem:[%s1371_s1] ss:$8 sps:$4 sm:$0xff]   ;;  %vm220_vm0 = vcmask 261120   ;;  %v1133_v7 = vmov 0.0  }
  0x15   : > { %237 = vmatpush1.bf16.msra.mxu0 %v1046_v1  ;;  %s890_s10 = sshll.u32 %s190_s9, 3  ;;  %935 = vmatprep.subr.bf16.mxu1 %v1133_v7  ;;  %vm1134_vm1 = vmmov 0   ;;  %vm335_vm2 = vcmask 1043456   ;;  %vm272_vm3 = vcmask 130048   ;;  %vm319_vm4 = vcmask 64512   ;;  %s1074_s7 = sshll.u32 %s1142_s6, 4  ;;  %s1075_s7 = int_to_ptr.vmem [resolvable:$false] %s1074_s7 }
  0x16   : > { %238 = vmatprep.subr.bf16.mxu0 %v1047_v3  ;;  %s192_s13 = scalar_lea.vmem %s1370_s0, %s890_s10  ;;  %937 = vmatprep.mubr.msk.bf16.mxu1 %vm1134_vm1, %v1133_v7  ;;  %vm725_vm5 = vcmask 392192   ;;  %vm767_vm6 = vcmask 523264   ;;  %s1076_s8 = scalar_lea.vmem %s1075_s7, 256 }
  0x17   : > { %v194_v5 = vld [vmem:[%s192_s13] sm:$0xff]  ;;  %s889_s13 = sshll.u32 %s186_s12, 3 }
  0x18   : > { %v195_v6 = vpack.c.bf16 %v194_v5, %v194_v5 }
  0x19   : > { %239 = vmatpush1.bf16.msra.mxu0 %v1049_v4 }
  0x1a   : > { %941 = vmatprep.subr.bf16.mxu0 %v1133_v7 }
  0x1c   : > { %895 = vmatmul.mubr.msk.bf16.vlgmr.msra.gmra.mxu0 %vm220_vm0, %v195_v6 }
  0x1d   : > { %943 = vmatprep.mubr.msk.bf16.mxu0 %vm1134_vm1, %v1133_v7 }
  0xdc   : > { %v258_v8 = vpop.f32.mrf.mxu0 }
  0xdd   : > { %v265_v9 = vmul.f32 0.25, %v258_v8  ;;  %v267_v10 = vpack.c.bf16 %v258_v8, %v258_v8 }
  0xde   : > { %v260_v11 = vpop.f32.mrf.mxu0 }
  0xdf   : > { %v266_v12 = vpack.c.bf16 %v265_v9, %v265_v9  ;;  %v1240_v13 = vpack.c.bf16 %v260_v11, %v260_v11  ;;  %270 = vrot.lane.b32.xlu0 %v267_v10, %s1135_s14 }
  0xe0   : > { %v262_v14 = vpop.f32.mrf.mxu0 }
  0xe1   : > { %380 = vrot.lane.b32.xlu1 %v266_v12, %s1136_s20  ;;  %v337_v15 = vsel %vm335_vm2, %v1240_v13, 0 }
  0xe2   : > { %v263_v16 = vpop.f32.mrf.mxu0  ;;  %942 = vmatpush3.bf16.msra.mxu0 %v337_v15 }
  0xe3   : > { %382 = vrot.lane.b32.xlu0 %v267_v10, %s1137_s22  ;;  %953 = vmatprep.subr.bf16.mxu0 %v1133_v7 }
  0xe5   : > { %493 = vrot.lane.b32.xlu1 %v267_v10, %s1138_s23 }
  0xe7   : > { %491 = vrot.lane.b32.xlu0 %v266_v12, %s1139_s27 }
  0xe9   : > { %603 = vrot.lane.b32.xlu1 %v267_v10, %s1140_s28 }
  0xeb   : > { %601 = vrot.lane.b32.xlu0 %v266_v12, %s1141_s29 }
 0x151   : > { %v271_v17 = vpop.permute.xlu0 %270 }
 0x152   : > { %v277_v18 = vsel %vm272_vm3, %v271_v17, 0 }
 0x153   : > { %936 = vmatpush3.bf16.xpose.msra.mxu1 %v277_v18  ;;  %v381_v20 = vpop.permute.xlu1 %380 }
 0x154   : > { %947 = vmatprep.subr.bf16.mxu1 %v1133_v7 }
 0x155   : > { %v383_v19 = vpop.permute.xlu0 %382 }
 0x156   : > { %v388_v21 = vsel %vm272_vm3, %v383_v19, 0 }
 0x157   : > { %v494_v22 = vpop.permute.xlu1 %493 }
 0x158   : > { %v499_v23 = vsel %vm272_vm3, %v494_v22, 0 }
 0x159   : > { %v492_v25 = vpop.permute.xlu0 %491 }
 0x15a   : > { %938 = vmatmul.mubr.msk.bf16.vlgmr.msra.gmra.mxu1 %vm272_vm3, %v266_v12 }
 0x15b   : > { %948 = vmatpush3.bf16.xpose.msra.mxu1 %v388_v21  ;;  %949 = vmatprep.mubr.msk.bf16.mxu1 %vm1134_vm1, %v1133_v7  ;;  %v604_v24 = vpop.permute.xlu1 %603 }
 0x15c   : > { %959 = vmatprep.subr.bf16.mxu1 %v1133_v7  ;;  %v609_v26 = vsel %vm272_vm3, %v604_v24, 0 }
 0x15d   : > { %v602_v27 = vpop.permute.xlu0 %601 }
 0x162   : > { %950 = vmatmul.mubr.msk.bf16.vlgmr.msra.gmra.mxu1 %vm272_vm3, %v381_v20 }
 0x163   : > { %960 = vmatpush3.bf16.xpose.msra.mxu1 %v499_v23  ;;  %961 = vmatprep.mubr.msk.bf16.mxu1 %vm1134_vm1, %v1133_v7 }
 0x164   : > { %971 = vmatprep.subr.bf16.mxu1 %v1133_v7 }
 0x16a   : > { %962 = vmatmul.mubr.msk.bf16.vlgmr.msra.gmra.mxu1 %vm272_vm3, %v492_v25 }
 0x16b   : > { %972 = vmatpush3.bf16.xpose.msra.mxu1 %v609_v26  ;;  %973 = vmatprep.mubr.msk.bf16.mxu1 %vm1134_vm1, %v1133_v7 }
 0x16c   : > { %983 = vmatprep.subr.bf16.mxu1 %v1133_v7 }
 0x172   : > { %974 = vmatmul.mubr.msk.bf16.vlgmr.msra.gmra.mxu1 %vm272_vm3, %v602_v27 }
 0x173   : > { %991 = vmatprep.mubr.msk.bf16.mxu1 %vm1134_vm1, %v1133_v7 }
 0x21a   : > { %v313_v28 = vpop.f32.mrf.mxu1 }
 0x21b   : > { %v320_v29 = vsel %vm319_vm4, %v313_v28, -inf }
 0x21c   : > { %321 = vmax.xlane.f32.xlu1 %v320_v29  ;;  %v939_v30 = vpop.f32.mrf.mxu1 }
 0x21d   : > { %v1050_v30 = vld [vmem:[%s1372_s2 + $0x18] sm:$0xff]  }
 0x21e   : > { %v316_v31 = vpop.f32.mrf.mxu1  ;;  %984 = vmatpush3.bf16.msra.mxu1 %v1050_v30 }
 0x21f   : > { %985 = vmatprep.subr.bf16.mxu1 %v1133_v7 }
 0x220   : > { %v940_v32 = vpop.f32.mrf.mxu1 }
 0x221   : > { %v1051_v32 = vld [vmem:[%s1372_s2 + $0x10] sm:$0xff]  }
 0x222   : > { %v424_v33 = vpop.f32.mrf.mxu1  ;;  %986 = vmatpush3.bf16.msra.mxu1 %v1051_v32 }
 0x223   : > { %v430_v34 = vsel %vm319_vm4, %v424_v33, -inf  ;;  %987 = vmatprep.subr.bf16.mxu1 %v1133_v7 }
 0x224   : > { %431 = vmax.xlane.f32.xlu0 %v430_v34  ;;  %v951_v35 = vpop.f32.mrf.mxu1 }
 0x225   : > { %v1052_v35 = vld [vmem:[%s1372_s2 + $0x8] sm:$0xff]  }
 0x226   : > { %v427_v36 = vpop.f32.mrf.mxu1  ;;  %988 = vmatpush3.bf16.msra.mxu1 %v1052_v35 }
 0x227   : > { %989 = vmatprep.subr.bf16.mxu1 %v1133_v7 }
 0x228   : > { %v952_v37 = vpop.f32.mrf.mxu1 }
 0x22a   : > { %v535_v38 = vpop.f32.mrf.mxu1 }
 0x22b   : > { %v541_v39 = vsel %vm319_vm4, %v535_v38, -inf }
 0x22c   : > { %542 = vmax.xlane.f32.xlu0 %v541_v39  ;;  %v963_v40 = vpop.f32.mrf.mxu1 }
 0x22e   : > { %v538_v41 = vpop.f32.mrf.mxu1 }
 0x230   : > { %v964_v42 = vpop.f32.mrf.mxu1 }
 0x231   : > { %v1053_v42 = vld [vmem:[%s1372_s2] sm:$0xff]  }
 0x232   : > { %v645_v43 = vpop.f32.mrf.mxu1  ;;  %990 = vmatpush3.bf16.msra.mxu1 %v1053_v42 }
 0x233   : > { %v651_v44 = vsel %vm319_vm4, %v645_v43, -inf }
 0x234   : > { %652 = vmax.xlane.f32.xlu1 %v651_v44  ;;  %v975_v45 = vpop.f32.mrf.mxu1 }
 0x236   : > { %v648_v46 = vpop.f32.mrf.mxu1 }
 0x238   : > { %v976_v47 = vpop.f32.mrf.mxu1 }
 0x2a5   : > { %v322_v48 = vpop.xlane.xlu1 %321 }
 0x2a6   : > { %v323_v49 = vsub.f32 %v313_v28, %v322_v48 }
 0x2a8   : > { %v324_v50 = vmul.f32 1.442695, %v323_v49 }
 0x2aa   : > { %1054 = vpow2.f32 %v324_v50 }
 0x2ad   : > { %v432_v51 = vpop.xlane.xlu0 %431 }
 0x2ae   : > { %v433_v52 = vsub.f32 %v424_v33, %v432_v51 }
 0x2b0   : > { %v434_v53 = vmul.f32 1.442695, %v433_v52 }
 0x2b2   : > { %1056 = vpow2.f32 %v434_v53  ;;  %v904_v53 = vld [vmem:[%s1373_s3] ss:$0 sm:$0xff] }
 0x2b5   : > { %v543_v54 = vpop.xlane.xlu0 %542 }
 0x2b6   : > { %v544_v55 = vsub.f32 %v535_v38, %v543_v54 }
 0x2b7   : > { %v1055_v56 = vpop.eup %1054 }
 0x2b8   : > { %v545_v57 = vmul.f32 1.442695, %v544_v55  ;;  %v326_v58 = vsel %vm319_vm4, %v1055_v56, 0.0 }
 0x2b9   : > { %327 = vadd.xlane.f32.xlu0 %v326_v58 }
 0x2ba   : > { %1058 = vpow2.f32 %v545_v57 }
 0x2bd   : > { %v653_v63 = vpop.xlane.xlu1 %652 }
 0x2be   : > { %v654_v0 = vsub.f32 %v645_v43, %v653_v63 }
 0x2bf   : > { %v1057_v59 = vpop.eup %1056 }
 0x2c0   : > { %v436_v60 = vsel %vm319_vm4, %v1057_v59, 0.0  ;;  %v655_v1 = vmul.f32 1.442695, %v654_v0 }
 0x2c1   : > { %437 = vadd.xlane.f32.xlu1 %v436_v60 }
 0x2c2   : > { %1060 = vpow2.f32 %v655_v1 }
 0x2c7   : > { %v1059_v61 = vpop.eup %1058 }
 0x2c8   : > { %v547_v62 = vsel %vm319_vm4, %v1059_v61, 0.0 }
 0x2c9   : > { %548 = vadd.xlane.f32.xlu0 %v547_v62 }
 0x2cf   : > { %v1061_v2 = vpop.eup %1060 }
 0x2d0   : > { %v657_v3 = vsel %vm319_vm4, %v1061_v2, 0.0 }
 0x2d2   : > { %553 = vrot.lane.b32.xlu1 %v1240_v13, %s1139_s27 }
 0x2df   : > { %443 = vrot.lane.b32.xlu0 %v1240_v13, %s1136_s20 }
 0x2f6   : > { %658 = vadd.xlane.f32.xlu1 %v657_v3 }
 0x307   : > { %663 = vrot.lane.b32.xlu1 %v1240_v13, %s1141_s29 }
 0x342   : > { %v328_v4 = vpop.xlane.xlu0 %327 }
 0x343   : > { %1062 = vrcp.f32 %v328_v4 }
 0x34a   : > { %v438_v5 = vpop.xlane.xlu1 %437 }
 0x34b   : > { %1064 = vrcp.f32 %v438_v5 }
 0x34e   : > { %v554_v15 = vpop.permute.xlu1 %553 }
 0x34f   : > { %v559_v17 = vsel %vm335_vm2, %v554_v15, 0 }
 0x350   : > { %v1063_v6 = vpop.eup %1062 }
 0x351   : > { %v330_v8 = vmul.f32 %v1063_v6, %v1055_v56 }
 0x352   : > { %v549_v9 = vpop.xlane.xlu0 %548 }
 0x353   : > { %1066 = vrcp.f32 %v549_v9  ;;  %v331_v10 = vpack.c.bf16 %v330_v8, %v330_v8 }
 0x355   : > { %944 = vmatmul.mubr.msk.bf16.vlgmr.msra.gmra.mxu0 %vm319_vm4, %v331_v10 }
 0x356   : > { %v444_v11 = vpop.permute.xlu0 %443  ;;  %955 = vmatprep.mubr.msk.bf16.mxu0 %vm1134_vm1, %v1133_v7 }
 0x357   : > { %v449_v12 = vsel %vm335_vm2, %v444_v11, 0 }
 0x358   : > { %v1065_v14 = vpop.eup %1064  ;;  %954 = vmatpush3.bf16.msra.mxu0 %v449_v12 }
 0x359   : > { %965 = vmatprep.subr.bf16.mxu0 %v1133_v7  ;;  %v440_v13 = vmul.f32 %v1065_v14, %v1057_v59 }
 0x35b   : > { %v441_v16 = vpack.c.bf16 %v440_v13, %v440_v13 }
 0x35d   : > { %956 = vmatmul.mubr.msk.bf16.vlgmr.msra.gmra.mxu0 %vm319_vm4, %v441_v16 }
 0x35e   : > { %966 = vmatpush3.bf16.msra.mxu0 %v559_v17  ;;  %967 = vmatprep.mubr.msk.bf16.mxu0 %vm1134_vm1, %v1133_v7 }
 0x35f   : > { %977 = vmatprep.subr.bf16.mxu0 %v1133_v7 }
 0x360   : > { %v1067_v18 = vpop.eup %1066 }
 0x361   : > { %v551_v19 = vmul.f32 %v1067_v18, %v1059_v61 }
 0x363   : > { %v552_v20 = vpack.c.bf16 %v551_v19, %v551_v19 }
 0x365   : > { %968 = vmatmul.mubr.msk.bf16.vlgmr.msra.gmra.mxu0 %vm319_vm4, %v552_v20 }
 0x366   : > { %979 = vmatprep.mubr.msk.bf16.mxu0 %vm1134_vm1, %v1133_v7 }
 0x37f   : > { %v659_v21 = vpop.xlane.xlu1 %658 }
 0x380   : > { %1068 = vrcp.f32 %v659_v21 }
 0x383   : > { %v664_v22 = vpop.permute.xlu1 %663 }
 0x384   : > { %v669_v23 = vsel %vm335_vm2, %v664_v22, 0 }
 0x385   : > { %978 = vmatpush3.bf16.msra.mxu0 %v669_v23 }
 0x38d   : > { %v1069_v24 = vpop.eup %1068 }
 0x38e   : > { %v661_v25 = vmul.f32 %v1069_v24, %v1061_v2 }
 0x390   : > { %v662_v26 = vpack.c.bf16 %v661_v25, %v661_v25 }
 0x392   : > { %980 = vmatmul.mubr.msk.bf16.vlgmr.msra.gmra.mxu0 %vm319_vm4, %v662_v26 }
 0x415   : > { %v373_v27 = vpop.f32.mrf.mxu0 }
 0x417   : > { %v945_v28 = vpop.f32.mrf.mxu0 }
 0x419   : > { %v376_v29 = vpop.f32.mrf.mxu0 }
 0x41b   : > { %v946_v31 = vpop.f32.mrf.mxu0 }
 0x41d   : > { %v485_v33 = vpop.f32.mrf.mxu0 }
 0x41e   : > { %712 = vrot.lane.b32.xlu0 %v485_v33, %s1140_s28 }
 0x41f   : > { %v957_v34 = vpop.f32.mrf.mxu0 }
 0x421   : > { %v488_v36 = vpop.f32.mrf.mxu0 }
 0x423   : > { %v958_v37 = vpop.f32.mrf.mxu0 }
 0x425   : > { %v595_v38 = vpop.f32.mrf.mxu0 }
 0x426   : > { %716 = vrot.lane.b32.xlu1 %v595_v38, %s1138_s23  ;;  %s188_s23 = scalar_lea.vmem [#allocation2], %s889_s13 }
 0x427   : > { %v969_v39 = vpop.f32.mrf.mxu0  ;;  %s826_s27 = sshll.u32 %s188_s23, 4  ;;  %s1330_s27 = int_to_ptr.vmem [resolvable:$true] %s826_s27 }
 0x428   : > { %p1077_p0 = scmp.lt.s32.totalorder %s1330_s27, %s1075_s7 }
 0x429   : > { %v598_v40 = vpop.f32.mrf.mxu0 }
 0x42b   : > { %v970_v41 = vpop.f32.mrf.mxu0 }
 0x452   : > { %v705_v43 = vpop.f32.mrf.mxu0 }
 0x453   : > { %720 = vrot.lane.b32.xlu0 %v705_v43, %s1137_s22  ;;  %s911_s22 = sshll.u32 %s1189_s19, 7  ;;  %s1070_s19 = scalar_lea.vmem %s1330_s27, 128 }
 0x454   : > { %v981_v44 = vpop.f32.mrf.mxu0  ;;  %s1328_s30 = scalar_lea.hbm %s1374_s4, %s911_s22  ;;  %p1071_p11 = scmp.ne.s32.totalorder %s1330_s27, %s1070_s19 }
 0x455   : > { %p1078_p1 = scmp.lt.s32.totalorder %s1076_s8, %s1070_s19 }
 0x456   : > { %v708_v45 = vpop.f32.mrf.mxu0  ;;  %p1072_p12 = pnand %p1071_p11, %p1206_p5 }
 0x457   : > { %p1079_p2 = por %p1078_p1, %p1077_p0 }
 0x458   : > { %v982_v46 = vpop.f32.mrf.mxu0  ;;  %p1073_p13 = pneg %p1072_p12 }
 0x45a   : > { %p1080_p3 = pnand %p1079_p2, %p1073_p13 }
 0x490   : > { %v713_v7 = vpop.permute.xlu0 %712 }
 0x491   : > { %v723_v48 = vsel %vm272_vm3, %v373_v27, %v713_v7 }
 0x498   : > { %v717_v47 = vpop.permute.xlu1 %716 }
 0x499   : > { %v724_v49 = vsel %vm220_vm0, %v723_v48, %v717_v47 }
 0x4c5   : > { %v721_v50 = vpop.permute.xlu0 %720 }
 0x4c6   : > { %v726_v51 = vsel %vm725_vm5, %v724_v49, %v721_v50 }
 0x4c7   : > { %v727_v52 = vpack.c.bf16 %v726_v51, %v726_v51 }
 0x4c9   : > { %992 = vmatmul.mubr.msk.bf16.vlgmr.msra.gmra.mxu1 %vm767_vm6, %v727_v52 }
 0x589   : > { %v805_v54 = vpop.f32.mrf.mxu1 }
 0x58a   : > { %v806_v55 = vadd.f32 %v904_v53, %v805_v54 }
 0x58b   : > { %v993_v56 = vpop.f32.mrf.mxu1 }
 0x58c   : > { %811 = vst.msk [vmem:[%s188_s23] sm:$0xff] %vm220_vm0, %v806_v55 }
 0x58d   : > { %v808_v57 = vpop.f32.mrf.mxu1 }
 0x58e   : > { %1083 = shalt.err (!%p1080_p3)
}
 0x58f   : > { %s1084_s9 = scalar_lea.hbm %s1328_s30, 128  ;;  %s1088_s12 = scalar_lea.hbm %s1374_s4, 256 }
 0x590   : > { %p1085_p4 = scmp.ne.s32.totalorder %s1328_s30, %s1084_s9  ;;  %p1089_p9 = scmp.lt.s32.totalorder %s1328_s30, %s1374_s4 }
 0x591   : > { %p1090_p10 = scmp.lt.s32.totalorder %s1088_s12, %s1084_s9 }
 0x592   : > { %p1086_p7 = pnand %p1085_p4, %p1206_p5 }
 0x593   : > { %p1091_p11 = por %p1090_p10, %p1089_p9 }
 0x594   : > { %p1087_p8 = pneg %p1086_p7 }
 0x596   : > { %p1092_p12 = pnand %p1091_p11, %p1087_p8 }
 0x598   : > { %1095 = shalt.err (!%p1092_p12)
}
 0x599   : > { %995 = dma.vmem_to_hbm [thread:$0]  (%p1206_p5), %s1330_s27, 128, %s1328_s30, %s813_s5   ;;  %v994_v58 = vpop.f32.mrf.mxu1 }
 0x59a PF: > { %p1001_p13 = scmp.ge.s32.totalorder %s1130_s18, 2  ;;  %s838_s20 = sand.u32 1, %s1118_s15  }
 0x59b   : > { %s839_s22 = scalar_lea.sflag [#allocation3], %s838_s20 }
 0x59c   : > { %p998_p0 = pnand %p1001_p13, %p1210_p6 }
 0x59e   : > { %p999_p1 = pneg %p998_p0 }
 0x5a0   : > { %1113 = dma.done.wait (%p999_p1), %s839_s22, 128  }
 0x5a1   : > { %1115 = vsyncadd (%p999_p1), %s839_s22, 4294967168  ;;  %p14_p2 = scmp.ge.s32.totalorder %s1193_s21, 4   ;;  %s1377_s15 = smov %s1122_s16 }
 0x5a2   : > { %s1378_s16 = smov %s1126_s17  ;;  %s1379_s17 = smov %s1204_s24 }
 0x5a3   : > { %s1380_s18 = smov %s1193_s21  ;;  %16 = sbr.rel (!%p14_p2) target bundleno = 3 (0x3), region = 71 }
 0x5a8   :  { %844 = vsyncpa [#allocation3], 1 }
 0x5a9   :  { %846 = vsyncpa [#allocation3 + $0x1], 1 }

</bundles_post_ra>
